<compile_context>
chip_gen: v6e
topology: v6e:2x2x1
jax: 0.10.0
libtpu: 0.0.40
codegen_flags: <defaults>
</compile_context>

<pallas_src>
import functools

import jax
import jax.numpy as jnp
from jax.experimental import pallas as pl
from jax.experimental.pallas import tpu as pltpu

_LANES = 128
_SUBLANES = 8


def _round_up(x, m):
    return -(-x // m) * m


def _tpu_vmem_capacity_bytes():
    """Physical VMEM per TensorCore; conservative (v7x-sized) fallback."""
    try:
        return int(pltpu.get_tpu_info().vmem_capacity_bytes)
    except Exception:
        return 64 * 1024 * 1024


def _partial_conv_kernel(x_ref, w_ref, b_ref, o_ref, *acc_scratch,
                         TH, W_out_pad, KH, KW, C, fold_kw):
    """One (batch, H-tile) block per grid step.

    x_ref  : (Hp, Wp_pad, C)            padded NHWC image (batch squeezed)
    w_ref  : (KH, KW*C, O_pad)          if fold_kw  (whole-array VMEM resident)
             (KH*KW, C, O_pad)          otherwise
    b_ref  : (1, O_pad)                 f32 bias (whole-array VMEM resident)
    o_ref  : (TH*W_out_pad, O_pad)      flattened output tile
    acc_scratch: optional f32 VMEM accumulator (only when o_ref is not f32)
    """
    acc_ref = acc_scratch[0] if acc_scratch else o_ref
    row0 = pl.program_id(1) * TH

    def taps():
        for kh in range(KH):
            slab = x_ref[pl.ds(row0 + kh, TH), :, :]          # (TH, Wp_pad, C)
            if fold_kw:
                # Small C: fold KW taps into the contraction dim (K = KW*C).
                patch = jnp.concatenate(
                    [slab[:, kw:kw + W_out_pad, :] for kw in range(KW)], axis=-1)
                yield patch.reshape(TH * W_out_pad, KW * C), w_ref[kh]
            else:
                # Large C: per-tap K = C matmuls -- no im2col concat/relayout.
                for kw in range(KW):
                    lhs = slab[:, kw:kw + W_out_pad, :].reshape(TH * W_out_pad, C)
                    yield lhs, w_ref[kh * KW + kw]

    first = True
    for lhs, rhs in taps():
        contrib = jnp.dot(lhs, rhs, preferred_element_type=jnp.float32)
        if first:
            # Fuse the bias into the first store: no broadcast-init pass,
            # one fewer accumulator round-trip on the scarce vst slot.
            acc_ref[...] = contrib + b_ref[...]
            first = False
        else:
            acc_ref[...] += contrib

    if acc_scratch:
        o_ref[...] = acc_ref[...].astype(o_ref.dtype)


def fold_partial_conv_params(weight_oihw, bias_o, *, part_splits, part_index,
                             compute_dtype=None):
    """One-time (per layer) weight prep: slice the output-channel range, pad O
    to a lane multiple, and lay the weights out for the kernel."""
    O_full, C, KH, KW = weight_oihw.shape
    offsets = [0]
    for s in part_splits:
        offsets.append(offsets[-1] + s)
    o_lo, o_hi = offsets[part_index], offsets[part_index + 1]
    O = o_hi - o_lo
    O_pad = _round_up(max(O, _LANES), _LANES)
    w_dtype = weight_oihw.dtype if compute_dtype is None else compute_dtype

    w_hwio = jnp.transpose(weight_oihw[o_lo:o_hi], (2, 3, 1, 0))   # (KH,KW,C,O)
    w_hwio = jnp.pad(w_hwio, ((0, 0), (0, 0), (0, 0), (0, O_pad - O)))
    fold_kw = C < _LANES   # fold taps only when C is too small to feed the MXU
    if fold_kw:
        w_kernel = w_hwio.reshape(KH, KW * C, O_pad).astype(w_dtype)
    else:
        w_kernel = w_hwio.reshape(KH * KW, C, O_pad).astype(w_dtype)
    b_kernel = jnp.pad(bias_o[o_lo:o_hi], (0, O_pad - O))
    b_kernel = b_kernel.astype(jnp.float32).reshape(1, O_pad)
    meta = dict(KH=KH, KW=KW, C=C, O=O, O_pad=O_pad, fold_kw=fold_kw)
    return w_kernel, b_kernel, meta


def partial_conv2d_nhwc(x_nhwc, w_kernel, b_kernel, *, meta, padding=1,
                        stride=1, block_h=None, compute_dtype=None):
    """Partial conv on NHWC input with pre-folded weights (the hot path)."""
    if stride != 1:
        # TODO(synk): extend to strided convs (ResNet stem 7x7/s2, 1x1/s2).
        raise NotImplementedError("partial_conv2d kernel only supports stride=1")

    KH, KW, C, O, O_pad, fold_kw = (meta[k] for k in
                                    ("KH", "KW", "C", "O", "O_pad", "fold_kw"))
    N, H, W, C_x = x_nhwc.shape
    assert C_x == C, (C_x, C)

    in_dtype = x_nhwc.dtype if compute_dtype is None else compute_dtype
    out_dtype = x_nhwc.dtype
    itemsize = jnp.dtype(in_dtype).itemsize

    Hp = H + 2 * padding
    H_out = Hp - KH + 1
    W_out = W + 2 * padding - KW + 1
    # Sublane-aligned output width (8 for f32, 16 for bf16); extra columns are
    # computed on zero padding and sliced off by the caller.
    sub_mult = _SUBLANES if itemsize >= 4 else (16 if itemsize == 2 else 32)
    W_out_pad = _round_up(W_out, sub_mult)
    Wp_pad = W_out_pad + KW - 1

    x_pad = jnp.pad(x_nhwc.astype(in_dtype),
                    ((0, 0), (padding, padding),
                     (padding, Wp_pad - W - padding), (0, 0)))

    vmem_cap = _tpu_vmem_capacity_bytes()
    small_vmem = vmem_cap <= 64 * 1024 * 1024        # v7x-sized core
    if block_h is None:
        target_rows = 512 if small_vmem else 1536    # bigger tiles on v5e/v6e
        max_th = H_out
        if small_vmem and N == 1 and H_out >= 2:
            max_th = max(1, H_out // 2)              # keep both v7x TCs busy
        TH = 1
        for th in range(1, max_th + 1):
            if H_out % th == 0 and th * W_out_pad <= target_rows:
                TH = th
    else:
        TH = block_h
        assert H_out % TH == 0, (H_out, TH)
    n_h = H_out // TH

    kernel = functools.partial(_partial_conv_kernel, TH=TH, W_out_pad=W_out_pad,
                               KH=KH, KW=KW, C=C, fold_kw=fold_kw)

    out_is_f32 = jnp.dtype(out_dtype) == jnp.dtype(jnp.float32)
    # f32 outputs: accumulate directly into the output block (no scratch).
    scratch_shapes = ([] if out_is_f32
                      else [pltpu.VMEM((TH * W_out_pad, O_pad), jnp.float32)])

    cost = pl.CostEstimate(
        flops=2 * N * H_out * W_out * KH * KW * C * O,
        transcendentals=0,
        bytes_accessed=(x_pad.size * itemsize
                        + w_kernel.size * jnp.dtype(w_kernel.dtype).itemsize
                        + b_kernel.size * 4
                        + N * H_out * W_out * O * jnp.dtype(out_dtype).itemsize))

    # Leave headroom for Mosaic internal scratch: ~50 MiB on v7x, ~100 MiB on
    # v5e/v6e (128 MiB physical).
    vmem_limit = min(int(vmem_cap * 0.78), 100 * 1024 * 1024)

    out_flat = pl.pallas_call(
        kernel,
        out_shape=jax.ShapeDtypeStruct((N, H_out * W_out_pad, O_pad), out_dtype),
        grid_spec=pltpu.PrefetchScalarGridSpec(
            num_scalar_prefetch=0,
            grid=(N, n_h),
            in_specs=[
                # Full padded image; block index constant across the inner h
                # axis -> stays resident in VMEM, no re-DMA per H tile.
                pl.BlockSpec((None, Hp, Wp_pad, C), lambda n, h: (n, 0, 0, 0)),
                # Constant operands: whole-array VMEM residents (single copy,
                # no per-step DMA, no double-buffering).
                pl.BlockSpec(memory_space=pltpu.MemorySpace.VMEM),
                pl.BlockSpec(memory_space=pltpu.MemorySpace.VMEM),
            ],
            out_specs=pl.BlockSpec((None, TH * W_out_pad, O_pad),
                                   lambda n, h: (n, h, 0)),
            scratch_shapes=scratch_shapes,
        ),
        compiler_params=pltpu.CompilerParams(
            dimension_semantics=("parallel", "parallel"),
            vmem_limit_bytes=vmem_limit),
        cost_estimate=cost,
    )(x_pad, w_kernel, b_kernel)

    # Un-flatten, drop the padded columns/lanes (NHWC out).
    out = out_flat.reshape(N, H_out, W_out_pad, O_pad)[:, :, :W_out, :O]
    return out


def partial_conv2d(x_nchw, weight_oihw, bias_o, *, part_splits, part_index,
                   padding=1, stride=1, block_h=None, compute_dtype=None):
    """NCHW/OIHW drop-in matching the torch layer:
    conv2d(x)[:, o_lo:o_hi] + bias[o_lo:o_hi] for part `part_index` of
    `part_splits`.  A real split-ResNet pipeline should instead call
    fold_partial_conv_params() once per layer and stay NHWC end-to-end via
    partial_conv2d_nhwc() (avoids per-call layout passes)."""
    w_kernel, b_kernel, meta = fold_partial_conv_params(
        weight_oihw, bias_o, part_splits=part_splits, part_index=part_index,
        compute_dtype=compute_dtype)
    x_nhwc = jnp.transpose(x_nchw, (0, 2, 3, 1))
    out_nhwc = partial_conv2d_nhwc(x_nhwc, w_kernel, b_kernel, meta=meta,
                                   padding=padding, stride=stride,
                                   block_h=block_h, compute_dtype=compute_dtype)
    return jnp.transpose(out_nhwc, (0, 3, 1, 2))


if __name__ == "__main__":
    key = jax.random.PRNGKey(0)
    kx, kw_, kb = jax.random.split(key, 3)

    # --- Test 1: f32, small-C (KW-folded) path; matches the torch layer ---
    N, C, H, W = 2, 4, 16, 16
    O_full, KH, KW = 16, 3, 3
    part_splits = [4, 8, 4]       # SplitConv2d(layer, [4, 8, 4])
    part_index = 1                # this proxy computes output channels 4:12

    x = jax.random.normal(kx, (N, C, H, W), dtype=jnp.float32)
    weight = jax.random.normal(kw_, (O_full, C, KH, KW), dtype=jnp.float32) * 0.1
    bias = jax.random.normal(kb, (O_full,), dtype=jnp.float32) * 0.1

    fwd = jax.jit(functools.partial(partial_conv2d,
                                    part_splits=part_splits,
                                    part_index=part_index,
                                    padding=1))
    out = jax.block_until_ready(fwd(x, weight, bias))

    o_lo, o_hi = 4, 12
    ref = jax.lax.conv_general_dilated(
        x, weight[o_lo:o_hi], window_strides=(1, 1),
        padding=((1, 1), (1, 1)),
        dimension_numbers=("NCHW", "OIHW", "NCHW"),
    ) + bias[o_lo:o_hi].reshape(1, -1, 1, 1)

    assert out.shape == (N, o_hi - o_lo, H, W), out.shape
    assert bool(jnp.allclose(out, ref, atol=1e-3, rtol=1e-3)), "mismatch (f32)"

    # --- Test 2: bf16 compute / f32 accumulation & output (MXU-native) ---
    fwd_bf16 = jax.jit(functools.partial(partial_conv2d,
                                         part_splits=part_splits,
                                         part_index=part_index,
                                         padding=1,
                                         block_h=8,
                                         compute_dtype=jnp.bfloat16))
    out_bf16 = jax.block_until_ready(fwd_bf16(x, weight, bias))
    assert bool(jnp.allclose(out_bf16, ref, atol=1e-1, rtol=1e-1)), "mismatch (bf16 compute)"

    # --- Test 3: large-C (per-tap K=C, no concat) path, bf16 in/out (scratch acc) ---
    k2x, k2w, k2b = jax.random.split(jax.random.PRNGKey(0), 3)
    N2, C2, H2, W2 = 1, 128, 8, 8
    x2 = (jax.random.normal(k2x, (N2, C2, H2, W2), jnp.float32) * 0.5).astype(jnp.bfloat16)
    w2 = (jax.random.normal(k2w, (16, C2, 3, 3), jnp.float32) * 0.05).astype(jnp.bfloat16)
    b2 = (jax.random.normal(k2b, (16,), jnp.float32) * 0.1).astype(jnp.bfloat16)

    fwd2 = jax.jit(functools.partial(partial_conv2d,
                                     part_splits=[8, 8], part_index=0, padding=1))
    out2 = jax.block_until_ready(fwd2(x2, w2, b2))
    ref2 = jax.lax.conv_general_dilated(
        x2.astype(jnp.float32), w2[:8].astype(jnp.float32),
        window_strides=(1, 1), padding=((1, 1), (1, 1)),
        dimension_numbers=("NCHW", "OIHW", "NCHW"),
    ) + b2[:8].astype(jnp.float32).reshape(1, -1, 1, 1)
    assert out2.shape == (N2, 8, H2, W2), out2.shape
    assert bool(jnp.allclose(out2.astype(jnp.float32), ref2, atol=2e-1, rtol=2e-1)), \
        "mismatch (large-C bf16)"

    print("KERNEL_OK")
</pallas_src>

<mosaic_0001>
module attributes {stable_mosaic.version = 11 : i64} {
  func.func @_partial_conv_kernel(%arg0: i32, %arg1: i32, %arg2: memref<1x18x18x4xf32, #tpu.memory_space<vmem>>, %arg3: memref<3x12x128xf32, #tpu.memory_space<vmem>>, %arg4: memref<1x128xf32, #tpu.memory_space<vmem>>, %arg5: memref<1x256x128xf32, #tpu.memory_space<vmem>>) attributes {dimension_semantics = [#tpu.dimension_semantics<parallel>, #tpu.dimension_semantics<parallel>], iteration_bounds = array<i64: 2, 1>, scalar_prefetch = 0 : i64, scratch_operands = 0 : i64, tpu.core_type = #tpu.core_type<tc>, window_params = [{transform_indices = @transform_0, window_bounds = array<i64: 1, 18, 18, 4>}, {pipeline_mode = #tpu.pipeline_mode<synchronous>, transform_indices = @transform_1, window_bounds = array<i64: 3, 12, 128>}, {pipeline_mode = #tpu.pipeline_mode<synchronous>, transform_indices = @transform_2, window_bounds = array<i64: 1, 128>}, {transform_indices = @transform_3, window_bounds = array<i64: 1, 256, 128>}]} {
    %c16_i32 = arith.constant 16 : i32
    %0 = arith.muli %arg1, %c16_i32 : i32
    %c0_i32 = arith.constant 0 : i32
    %1 = arith.addi %0, %c0_i32 : i32
    %c0 = arith.constant 0 : index
    %2 = arith.index_cast %1 : i32 to index
    %c0_0 = arith.constant 0 : index
    %c0_1 = arith.constant 0 : index
    %3 = vector.load %arg2[%c0, %2, %c0_0, %c0_1] : memref<1x18x18x4xf32, #tpu.memory_space<vmem>>, vector<1x16x18x4xf32>
    %4 = vector.shape_cast %3 : vector<1x16x18x4xf32> to vector<16x18x4xf32>
    %5 = vector.extract_strided_slice %4 {offsets = [0, 0, 0], sizes = [16, 16, 4], strides = [1, 1, 1]} : vector<16x18x4xf32> to vector<16x16x4xf32>
    %6 = vector.extract_strided_slice %4 {offsets = [0, 1, 0], sizes = [16, 16, 4], strides = [1, 1, 1]} : vector<16x18x4xf32> to vector<16x16x4xf32>
    %7 = vector.extract_strided_slice %4 {offsets = [0, 2, 0], sizes = [16, 16, 4], strides = [1, 1, 1]} : vector<16x18x4xf32> to vector<16x16x4xf32>
    %8 = tpu.concatenate %5, %6, %7 in 2 : vector<16x16x4xf32>, vector<16x16x4xf32>, vector<16x16x4xf32> -> vector<16x16x12xf32>
    %9 = vector.shape_cast %8 : vector<16x16x12xf32> to vector<256x12xf32>
    %c0_2 = arith.constant 0 : index
    %c0_3 = arith.constant 0 : index
    %c0_4 = arith.constant 0 : index
    %10 = vector.load %arg3[%c0_2, %c0_3, %c0_4] : memref<3x12x128xf32, #tpu.memory_space<vmem>>, vector<1x12x128xf32>
    %11 = vector.shape_cast %10 : vector<1x12x128xf32> to vector<12x128xf32>
    %cst = arith.constant dense<0.000000e+00> : vector<256x128xf32>
    %12 = tpu.matmul %9, %11, %cst {dimension_numbers = #tpu.dot_dimension_numbers<[1], [0], [0], [1], [0, 0, 1, 1], [], []>} : vector<256x12xf32>, vector<12x128xf32>, vector<256x128xf32> -> vector<256x128xf32>
    %c0_5 = arith.constant 0 : index
    %c0_6 = arith.constant 0 : index
    %13 = vector.load %arg4[%c0_5, %c0_6] : memref<1x128xf32, #tpu.memory_space<vmem>>, vector<1x128xf32>
    %14 = vector.broadcast %13 : vector<1x128xf32> to vector<256x128xf32>
    %15 = arith.addf %12, %14 : vector<256x128xf32>
    %c0_7 = arith.constant 0 : index
    %c0_8 = arith.constant 0 : index
    %c0_9 = arith.constant 0 : index
    %16 = vector.load %arg5[%c0_7, %c0_8, %c0_9] : memref<1x256x128xf32, #tpu.memory_space<vmem>>, vector<1x256x128xf32>
    %17 = vector.shape_cast %16 : vector<1x256x128xf32> to vector<256x128xf32>
    %18 = vector.shape_cast %15 : vector<256x128xf32> to vector<1x256x128xf32>
    tpu.vector_store %arg5[%c0_7, %c0_8, %c0_9], %18 {strides = array<i32>} : memref<1x256x128xf32, #tpu.memory_space<vmem>>, vector<1x256x128xf32>,
    %c1_i32 = arith.constant 1 : i32
    %19 = arith.addi %0, %c1_i32 : i32
    %c0_10 = arith.constant 0 : index
    %20 = arith.index_cast %19 : i32 to index
    %c0_11 = arith.constant 0 : index
    %c0_12 = arith.constant 0 : index
    %21 = vector.load %arg2[%c0_10, %20, %c0_11, %c0_12] : memref<1x18x18x4xf32, #tpu.memory_space<vmem>>, vector<1x16x18x4xf32>
    %22 = vector.shape_cast %21 : vector<1x16x18x4xf32> to vector<16x18x4xf32>
    %23 = vector.extract_strided_slice %22 {offsets = [0, 0, 0], sizes = [16, 16, 4], strides = [1, 1, 1]} : vector<16x18x4xf32> to vector<16x16x4xf32>
    %24 = vector.extract_strided_slice %22 {offsets = [0, 1, 0], sizes = [16, 16, 4], strides = [1, 1, 1]} : vector<16x18x4xf32> to vector<16x16x4xf32>
    %25 = vector.extract_strided_slice %22 {offsets = [0, 2, 0], sizes = [16, 16, 4], strides = [1, 1, 1]} : vector<16x18x4xf32> to vector<16x16x4xf32>
    %26 = tpu.concatenate %23, %24, %25 in 2 : vector<16x16x4xf32>, vector<16x16x4xf32>, vector<16x16x4xf32> -> vector<16x16x12xf32>
    %27 = vector.shape_cast %26 : vector<16x16x12xf32> to vector<256x12xf32>
    %c1 = arith.constant 1 : index
    %c0_13 = arith.constant 0 : index
    %c0_14 = arith.constant 0 : index
    %28 = vector.load %arg3[%c1, %c0_13, %c0_14] : memref<3x12x128xf32, #tpu.memory_space<vmem>>, vector<1x12x128xf32>
    %29 = vector.shape_cast %28 : vector<1x12x128xf32> to vector<12x128xf32>
    %cst_15 = arith.constant dense<0.000000e+00> : vector<256x128xf32>
    %30 = tpu.matmul %27, %29, %cst_15 {dimension_numbers = #tpu.dot_dimension_numbers<[1], [0], [0], [1], [0, 0, 1, 1], [], []>} : vector<256x12xf32>, vector<12x128xf32>, vector<256x128xf32> -> vector<256x128xf32>
    %c0_16 = arith.constant 0 : index
    %c0_17 = arith.constant 0 : index
    %c0_18 = arith.constant 0 : index
    %31 = vector.load %arg5[%c0_16, %c0_17, %c0_18] : memref<1x256x128xf32, #tpu.memory_space<vmem>>, vector<1x256x128xf32>
    %32 = vector.shape_cast %31 : vector<1x256x128xf32> to vector<256x128xf32>
    %33 = arith.addf %32, %30 : vector<256x128xf32>
    %c0_19 = arith.constant 0 : index
    %c0_20 = arith.constant 0 : index
    %c0_21 = arith.constant 0 : index
    %34 = vector.load %arg5[%c0_19, %c0_20, %c0_21] : memref<1x256x128xf32, #tpu.memory_space<vmem>>, vector<1x256x128xf32>
    %35 = vector.shape_cast %34 : vector<1x256x128xf32> to vector<256x128xf32>
    %36 = vector.shape_cast %33 : vector<256x128xf32> to vector<1x256x128xf32>
    tpu.vector_store %arg5[%c0_19, %c0_20, %c0_21], %36 {strides = array<i32>} : memref<1x256x128xf32, #tpu.memory_space<vmem>>, vector<1x256x128xf32>,
    %c2_i32 = arith.constant 2 : i32
    %37 = arith.addi %0, %c2_i32 : i32
    %c0_22 = arith.constant 0 : index
    %38 = arith.index_cast %37 : i32 to index
    %c0_23 = arith.constant 0 : index
    %c0_24 = arith.constant 0 : index
    %39 = vector.load %arg2[%c0_22, %38, %c0_23, %c0_24] : memref<1x18x18x4xf32, #tpu.memory_space<vmem>>, vector<1x16x18x4xf32>
    %40 = vector.shape_cast %39 : vector<1x16x18x4xf32> to vector<16x18x4xf32>
    %41 = vector.extract_strided_slice %40 {offsets = [0, 0, 0], sizes = [16, 16, 4], strides = [1, 1, 1]} : vector<16x18x4xf32> to vector<16x16x4xf32>
    %42 = vector.extract_strided_slice %40 {offsets = [0, 1, 0], sizes = [16, 16, 4], strides = [1, 1, 1]} : vector<16x18x4xf32> to vector<16x16x4xf32>
    %43 = vector.extract_strided_slice %40 {offsets = [0, 2, 0], sizes = [16, 16, 4], strides = [1, 1, 1]} : vector<16x18x4xf32> to vector<16x16x4xf32>
    %44 = tpu.concatenate %41, %42, %43 in 2 : vector<16x16x4xf32>, vector<16x16x4xf32>, vector<16x16x4xf32> -> vector<16x16x12xf32>
    %45 = vector.shape_cast %44 : vector<16x16x12xf32> to vector<256x12xf32>
    %c2 = arith.constant 2 : index
    %c0_25 = arith.constant 0 : index
    %c0_26 = arith.constant 0 : index
    %46 = vector.load %arg3[%c2, %c0_25, %c0_26] : memref<3x12x128xf32, #tpu.memory_space<vmem>>, vector<1x12x128xf32>
    %47 = vector.shape_cast %46 : vector<1x12x128xf32> to vector<12x128xf32>
    %cst_27 = arith.constant dense<0.000000e+00> : vector<256x128xf32>
    %48 = tpu.matmul %45, %47, %cst_27 {dimension_numbers = #tpu.dot_dimension_numbers<[1], [0], [0], [1], [0, 0, 1, 1], [], []>} : vector<256x12xf32>, vector<12x128xf32>, vector<256x128xf32> -> vector<256x128xf32>
    %c0_28 = arith.constant 0 : index
    %c0_29 = arith.constant 0 : index
    %c0_30 = arith.constant 0 : index
    %49 = vector.load %arg5[%c0_28, %c0_29, %c0_30] : memref<1x256x128xf32, #tpu.memory_space<vmem>>, vector<1x256x128xf32>
    %50 = vector.shape_cast %49 : vector<1x256x128xf32> to vector<256x128xf32>
    %51 = arith.addf %50, %48 : vector<256x128xf32>
    %c0_31 = arith.constant 0 : index
    %c0_32 = arith.constant 0 : index
    %c0_33 = arith.constant 0 : index
    %52 = vector.load %arg5[%c0_31, %c0_32, %c0_33] : memref<1x256x128xf32, #tpu.memory_space<vmem>>, vector<1x256x128xf32>
    %53 = vector.shape_cast %52 : vector<1x256x128xf32> to vector<256x128xf32>
    %54 = vector.shape_cast %51 : vector<256x128xf32> to vector<1x256x128xf32>
    tpu.vector_store %arg5[%c0_31, %c0_32, %c0_33], %54 {strides = array<i32>} : memref<1x256x128xf32, #tpu.memory_space<vmem>>, vector<1x256x128xf32>,
    return
  }
  func.func @transform_0(%arg0: i32, %arg1: i32) -> (i32, i32, i32, i32) {
    %c0_i32 = arith.constant 0 : i32
    %c0_i32_0 = arith.constant 0 : i32
    %c0_i32_1 = arith.constant 0 : i32
    %c0_i32_2 = arith.constant 0 : i32
    return %arg0, %c0_i32, %c0_i32_0, %c0_i32_1 : i32, i32, i32, i32
  }
  func.func @transform_1(%arg0: i32, %arg1: i32) -> (i32, i32, i32) {
    %c0_i32 = arith.constant 0 : i32
    %c0_i32_0 = arith.constant 0 : i32
    %c0_i32_1 = arith.constant 0 : i32
    %c0_i32_2 = arith.constant 0 : i32
    return %c0_i32, %c0_i32_0, %c0_i32_1 : i32, i32, i32
  }
  func.func @transform_2(%arg0: i32, %arg1: i32) -> (i32, i32) {
    %c0_i32 = arith.constant 0 : i32
    %c0_i32_0 = arith.constant 0 : i32
    %c0_i32_1 = arith.constant 0 : i32
    return %c0_i32, %c0_i32_0 : i32, i32
  }
  func.func @transform_3(%arg0: i32, %arg1: i32) -> (i32, i32, i32) {
    %c0_i32 = arith.constant 0 : i32
    %c0_i32_0 = arith.constant 0 : i32
    return %arg0, %arg1, %c0_i32 : i32, i32, i32
  }
}

</mosaic_0001>

<bundles_post_ra>
// kernel: partial_conv2d.1
= control target key start
LH: loop header
LB: loop body
LE: loop exit
PB: predicated region body
PF: predicated region fallthrough
CT: control target
= control target key end

     0   :  { %s3607_s12 = smov 0   ;;  %s3609_s13 = smov 0   ;;  %s5269_s0 = inlined_call_operand.vmem [shape: f32[2,18,18,4], index: 0, kind: input, shape index: {}]   ;;  %s5270_s1 = inlined_call_operand.vmem [shape: f32[3,12,128], index: 1, kind: input, shape index: {}]   ;;  %s5271_s2 = inlined_call_operand.vmem [shape: f32[1,128], index: 2, kind: input, shape index: {}]   ;;  %s5272_s3 = inlined_call_operand.vmem [shape: f32[2,256,128], index: 3, kind: output, shape index: {}]  }
   0x1   :  { %s3611_s14 = smov 0  }
   0x2 LB: > { %s25_s15 = sadd.s32 1, %s3579_s13  ;;  %p3051_p0 = scmp.ge.s32.totalorder %s3583_s14, 1  ;;  %s3583_s14 = sphi %s3611_s14, %s13_s14   ;;  %s3579_s13 = sphi %s3609_s13, %s5326_s13   ;;  %s3575_s12 = sphi %s3607_s12, %s5325_s12  }
   0x3   : > { %p27_p1 = scmp.ge.s32.totalorder %s25_s15, 2  ;;  %p151_p2 = scmp.lt.s32.totalorder %s3583_s14, 3 }
   0x5   : > { %s5328_s15 = smov (%p27_p1, %s25_s15), 0  ;;  %p152_p3 = pnand %p3051_p0, %p151_p2 }
   0x7   : > { %155 = sbr.rel (%p152_p3) target bundleno = 718 (0x2ce), region = 32 }
   0xc   : > { %p179_p4 = scmp.lt.s32.totalorder %s3575_s12, 1  ;;  %vm293_vm0 = vcmask 1046528   ;;  %s3585_s20 = smov 4   ;;  %vm470_vm1 = vcmask 1045504   ;;  %vm819_vm2 = vcmask 1043456   ;;  %vm680_vm3 = vcmask 64512  }
   0xd   : > { %s3586_s21 = smov 8   ;;  %vm647_vm4 = vcmask 31744   ;;  %vm722_vm5 = vcmask 97280  }
   0xe   : > { %s5330_s12 = smov (!%p179_p4, %s3575_s12), 1 }
   0xf   : > { %s3520_s16 = smul.u32 432, %s5330_s12  ;;  %s3257_s9 = sshll.u32 %s5330_s12, 8 }
  0x10   : > { %s5133_s12 = scalar_lea.vmem %s5272_s3, %s3257_s9 }
  0x11   : > { %s3631_s19 = scalar_lea.vmem %s5269_s0, %s3520_s16 }
  0x12   : > { %v3634_v0 = vld [vmem:[%s3631_s19 + $0x18] sm:$0xff]  ;;  %v3637_v1 = vld [vmem:[%s3631_s19 + $0x20] sm:$0xff]  ;;  %v3647_v5 = vld [vmem:[%s3631_s19 + $0x8] sm:$0xff] }
  0x13   : > { %v3640_v2 = vld [vmem:[%s3631_s19] sm:$0xff]  ;;  %v299_v3 = vrot.slane %v3634_v0, 1  ;;  %v3644_v4 = vrot.slane %v3637_v1, 1  ;;  %v3651_v7 = vld [vmem:[%s3631_s19 + $0x28] sm:$0x3]  ;;  %v295_v8 = vrot.slane %v3647_v5, 1 }
  0x14   : > { %v294_v6 = vrot.slane %v3640_v2, 1  ;;  %v302_v9 = vrot.slane %v3651_v7, 1  ;;  %v3656_v10 = vld [vmem:[%s3631_s19 + $0x10] sm:$0x3]  ;;  %v3659_v11 = vld [vmem:[%s3631_s19 + $0x38] sm:$0xff]  ;;  %v3691_v24 = vld [vmem:[%s3631_s19 + $0x48] sm:$0xff] }
  0x15   : > { %v3663_v12 = vsel %vm293_vm0, %v299_v3, %v3644_v4  ;;  %v297_v13 = vrot.slane %v3656_v10, 1  ;;  %v3667_v14 = vld [vmem:[%s3631_s19 + $0x40] sm:$0x3]  ;;  %v3670_v15 = vld [vmem:[%s3631_s19 + $0x30] sm:$0xff]  ;;  %v3679_v18 = vrot.slane %v3659_v11, 1  ;;  %v309_v29 = vrot.slane %v3691_v24, 1 }
  0x16   : > { %378 = vrot.lane.b32.xlu1 %v3663_v12, %s3585_s20  ;;  %v296_v16 = vsel %vm293_vm0, %v294_v6, %v295_v8  ;;  %v303_v17 = vsel %vm293_vm0, %v3644_v4, %v302_v9  ;;  %v307_v19 = vrot.slane %v3667_v14, 1  ;;  %v304_v21 = vrot.slane %v3670_v15, 1  ;;  %v3685_v22 = vld [vmem:[%s3631_s19 + $0x50] sm:$0xff]  ;;  %v3688_v23 = vld [vmem:[%s3631_s19 + $0x58] sm:$0x3]  ;;  %v3707_v30 = vld [vmem:[%s3631_s19 + $0x68] sm:$0xff] }
  0x17   : > { %374 = vrot.lane.b32.xlu0 %v296_v16, %s3585_s20  ;;  %v298_v20 = vsel %vm293_vm0, %v295_v8, %v297_v13  ;;  %v3698_v26 = vrot.slane %v3685_v22, 1  ;;  %v312_v27 = vrot.slane %v3688_v23, 1  ;;  %5289 = vst [vmem:[#allocation2_spill] sm:$0xff] %v3707_v30  ;;  %v3710_v31 = vld [vmem:[%s3631_s19 + $0x70] sm:$0x3]  ;;  %v3713_v32 = vld [vmem:[%s3631_s19 + $0x60] sm:$0xff] }
  0x18   : > { %v308_v25 = vsel %vm293_vm0, %v3679_v18, %v307_v19  ;;  %v3703_v28 = vsel %vm293_vm0, %v304_v21, %v3679_v18  ;;  %5290 = vst [vmem:[#allocation3_spill] sm:$0xff] %v3713_v32  ;;  %v3721_v34 = vrot.slane %v3707_v30, 1  ;;  %v317_v35 = vrot.slane %v3710_v31, 1  ;;  %v3730_v38 = vld [vmem:[%s3631_s19 + $0x80] sm:$0xff]  ;;  %v3733_v39 = vld [vmem:[%s3631_s19 + $0x88] sm:$0x3] }
  0x19   : > { %v313_v33 = vsel %vm293_vm0, %v3698_v26, %v312_v27  ;;  %v3726_v36 = vsel %vm293_vm0, %v309_v29, %v3698_v26  ;;  %v314_v37 = vrot.slane %v3713_v32, 1  ;;  %5291 = vst [vmem:[#allocation4_spill] sm:$0xff] %v3730_v38  ;;  %v3736_v40 = vld [vmem:[%s3631_s19 + $0x78] sm:$0xff]  ;;  %v3744_v42 = vrot.slane %v3730_v38, 1  ;;  %v3753_v46 = vld [vmem:[%s3631_s19 + $0xc8] sm:$0xff]  ;;  %v3757_v48 = vld [vmem:[%s3631_s19 + $0xc0] sm:$0xff] }
  0x1a   : > { %380 = vrot.lane.b32.xlu1 %v303_v17, %s3585_s20  ;;  %5292 = vst [vmem:[#allocation5_spill] sm:$0xff] %v3736_v40  ;;  %v318_v41 = vsel %vm293_vm0, %v3721_v34, %v317_v35  ;;  %v322_v43 = vrot.slane %v3733_v39, 1  ;;  %v319_v45 = vrot.slane %v3736_v40, 1  ;;  %v223_v47 = vld [vmem:[%s3631_s19 + $0xd0] sm:$0x3]  ;;  %v335_v50 = vrot.slane %v3753_v46, 1 }
  0x1b   : > { %376 = vrot.lane.b32.xlu0 %v298_v20, %s3585_s20  ;;  %v3749_v44 = vsel %vm293_vm0, %v314_v37, %v3721_v34  ;;  %v337_v51 = vrot.slane %v223_v47, 1  ;;  %v334_v53 = vrot.slane %v3757_v48, 1  ;;  %v512_v55 = vrot.slane %v3753_v46, 2  ;;  %v3778_v59 = vld [vmem:[%s3631_s19 + $0xe0] sm:$0xff]  ;;  %v226_v60 = vld [vmem:[%s3631_s19 + $0xe8] sm:$0x3] }
  0x1c   : > { %v323_v49 = vsel %vm293_vm0, %v3744_v42, %v322_v43  ;;  %v3767_v52 = vsel %vm293_vm0, %v319_v45, %v3744_v42  ;;  %v514_v56 = vrot.slane %v223_v47, 2  ;;  %v511_v58 = vrot.slane %v3757_v48, 2  ;;  %v3782_v61 = vld [vmem:[%s3631_s19 + $0xd8] sm:$0xff]  ;;  %v229_v21 = vld [vmem:[%s3631_s19 + $0x100] sm:$0x3] }
  0x1d   : > { %v338_v54 = vsel %vm293_vm0, %v335_v50, %v337_v51  ;;  %v336_v57 = vsel %vm293_vm0, %v334_v53, %v335_v50  ;;  %v340_v63 = vrot.slane %v3778_v59, 1  ;;  %v342_v3 = vrot.slane %v226_v60, 1  ;;  %v3797_v20 = vld [vmem:[%s3631_s19 + $0xf8] sm:$0xff]  ;;  %v714_v47 = vld [vmem:[%s5270_s1 + $0x8] sm:$0xf]  ;;  %v3822_v53 = vld [vmem:[%s3631_s19 + $0x110] sm:$0xff] }
  0x1e   : > { %384 = vrot.lane.b32.xlu1 %v308_v25, %s3585_s20  ;;  %v515_v62 = vsel %vm470_vm1, %v512_v55, %v514_v56  ;;  %v513_v6 = vsel %vm470_vm1, %v511_v58, %v512_v55  ;;  %v339_v8 = vrot.slane %v3782_v61, 1  ;;  %v517_v13 = vrot.slane %v3778_v59, 2  ;;  %v3801_v25 = vld [vmem:[%s3631_s19 + $0xf0] sm:$0xff]  ;;  %v3819_v51 = vld [vmem:[%s3631_s19 + $0x108] sm:$0xff]  ;;  %3516 = vmatprep.subr.msk.mxu1 %vm819_vm2, %v714_v47 }
  0x1f   : > { %382 = vrot.lane.b32.xlu0 %v3703_v28, %s3585_s20  ;;  %v343_v9 = vsel %vm293_vm0, %v340_v63, %v342_v3  ;;  %v519_v16 = vrot.slane %v226_v60, 2  ;;  %v516_v19 = vrot.slane %v3782_v61, 2  ;;  %v345_v29 = vrot.slane %v3797_v20, 1  ;;  %3518 = vmatpush3.msk.msra.mxu1 %vm819_vm2, %v714_v47 }
  0x20   : > { %v341_v17 = vsel %vm293_vm0, %v339_v8, %v340_v63  ;;  %v344_v37 = vrot.slane %v3801_v25, 1  ;;  %v522_v43 = vrot.slane %v3797_v20, 2  ;;  %v524_v45 = vrot.slane %v229_v21, 2  ;;  %v232_v63 = vld [vmem:[%s3631_s19 + $0x118] sm:$0x3]  ;;  %3360 = vmatprep.subr.msk.mxu0 %vm819_vm2, %v714_v47 }
  0x21   : > { %v520_v27 = vsel %vm470_vm1, %v517_v13, %v519_v16  ;;  %v518_v35 = vsel %vm470_vm1, %v516_v19, %v517_v13  ;;  %v521_v50 = vrot.slane %v3801_v25, 2  ;;  %v349_v56 = vrot.slane %v3819_v51, 1  ;;  %3361 = vmatpush3.msk.msra.mxu0 %vm819_vm2, %v714_v47 }
  0x22   : > { %388 = vrot.lane.b32.xlu1 %v313_v33, %s3585_s20  ;;  %v347_v33 = vrot.slane %v229_v21, 1  ;;  %v525_v55 = vsel %vm470_vm1, %v522_v43, %v524_v45  ;;  %v471_v60 = vrot.slane %v3640_v2, 2  ;;  %v527_v16 = vrot.slane %v3822_v53, 2  ;;  %v235_v45 = vld [vmem:[%s3631_s19 + $0x130] sm:$0x3] }
  0x23   : > { %386 = vrot.lane.b32.xlu0 %v3726_v36, %s3585_s20  ;;  %v523_v58 = vsel %vm470_vm1, %v521_v50, %v522_v43  ;;  %v526_v21 = vrot.slane %v3819_v51, 2  ;;  %v3865_v43 = vrot.slane %v3637_v1, 2 }
  0x26   : > { %392 = vrot.lane.b32.xlu1 %v318_v41, %s3585_s20  ;;  %v348_v41 = vsel %vm293_vm0, %v345_v29, %v347_v33 }
  0x27   : > { %390 = vrot.lane.b32.xlu0 %v3749_v44, %s3585_s20 }
  0x2a   : > { %396 = vrot.lane.b32.xlu1 %v323_v49, %s3585_s20  ;;  %v346_v49 = vsel %vm293_vm0, %v344_v37, %v345_v29  ;;  %v3855_v29 = vld [vmem:[%s3631_s19 + $0x128] sm:$0xff]  ;;  %v528_v37 = vsel %vm470_vm1, %v526_v21, %v527_v16 }
  0x2b   : > { %394 = vrot.lane.b32.xlu0 %v3767_v52, %s3585_s20 }
  0x2e   : > { %408 = vrot.lane.b32.xlu1 %v338_v54, %s3585_s20  ;;  %v713_v54 = vld [vmem:[%s5270_s1] sm:$0xff] }
  0x2f   : > { %406 = vrot.lane.b32.xlu0 %v336_v57, %s3585_s20  ;;  %v350_v57 = vrot.slane %v3822_v53, 1  ;;  %3517 = vmatprep.subr.mxu1 %v713_v54 }
  0x30   : > { %3519 = vmatpush3.msra.mxu1 %v713_v54  ;;  %3362 = vmatprep.subr.mxu0 %v713_v54 }
  0x31   : > { %v351_v3 = vsel %vm293_vm0, %v349_v56, %v350_v57  ;;  %3363 = vmatpush3.msra.mxu0 %v713_v54  ;;  %v479_v54 = vrot.slane %v3651_v7, 2  ;;  %v532_v56 = vrot.slane %v3855_v29, 2 }
  0x32   : > { %585 = vrot.lane.b32.xlu1 %v515_v62, %s3586_s21  ;;  %v472_v62 = vrot.slane %v3647_v5, 2 }
  0x33   : > { %583 = vrot.lane.b32.xlu0 %v513_v6, %s3586_s21  ;;  %v352_v6 = vrot.slane %v232_v63, 1 }
  0x34   : > { %v473_v8 = vsel %vm470_vm1, %v471_v60, %v472_v62 }
  0x35   : > { %v353_v13 = vsel %vm293_vm0, %v350_v57, %v352_v6  ;;  %v534_v57 = vrot.slane %v235_v45, 2 }
  0x36   : > { %412 = vrot.lane.b32.xlu1 %v343_v9, %s3585_s20  ;;  %v474_v9 = vrot.slane %v3656_v10, 2 }
  0x37   : > { %410 = vrot.lane.b32.xlu0 %v341_v17, %s3585_s20  ;;  %v529_v17 = vrot.slane %v232_v63, 2  ;;  %v3888_v63 = vld [vmem:[%s3631_s19 + $0x140] sm:$0xff]  ;;  %v535_v7 = vsel %vm470_vm1, %v532_v56, %v534_v57  ;;  %v486_v57 = vrot.slane %v3691_v24, 2 }
  0x38   : > { %v475_v19 = vsel %vm470_vm1, %v472_v62, %v474_v9  ;;  %v3885_v62 = vld [vmem:[%s3631_s19 + $0x138] sm:$0xff]  ;;  %v360_v6 = vrot.slane %v3888_v63, 1  ;;  %v481_v9 = vrot.slane %v3670_v15, 2 }
  0x39   : > { %v530_v10 = vsel %vm470_vm1, %v527_v16, %v529_v17  ;;  %v238_v16 = vld [vmem:[%s3631_s19 + $0x148] sm:$0x3] }
  0x3a   : > { %589 = vrot.lane.b32.xlu1 %v520_v27, %s3586_s21  ;;  %v3852_v27 = vld [vmem:[%s3631_s19 + $0x120] sm:$0xff] }
  0x3b   : > { %587 = vrot.lane.b32.xlu0 %v518_v35, %s3586_s21  ;;  %v354_v33 = vrot.slane %v3852_v27, 1  ;;  %v355_v35 = vrot.slane %v3855_v29, 1  ;;  %v531_v60 = vrot.slane %v3852_v27, 2 }
  0x3d   : > { %v356_v47 = vsel %vm293_vm0, %v354_v33, %v355_v35 }
  0x3e   : > { %416 = vrot.lane.b32.xlu1 %v348_v41, %s3585_s20  ;;  %v476_v41 = vrot.slane %v3634_v0, 2 }
  0x3f   : > { %414 = vrot.lane.b32.xlu0 %v346_v49, %s3585_s20  ;;  %v357_v49 = vrot.slane %v235_v45, 1  ;;  %v536_v45 = vrot.slane %v3885_v62, 2 }
  0x40   : > { %v3873_v50 = vsel %vm470_vm1, %v476_v41, %v3865_v43 }
  0x42   : > { %593 = vrot.lane.b32.xlu1 %v525_v55, %s3586_s21  ;;  %v358_v55 = vsel %vm293_vm0, %v355_v35, %v357_v49  ;;  %v537_v35 = vrot.slane %v3888_v63, 2  ;;  %v3921_v49 = vld [vmem:[%s3631_s19 + $0x158] sm:$0xff] }
  0x43   : > { %591 = vrot.lane.b32.xlu0 %v523_v58, %s3586_s21  ;;  %v480_v58 = vsel %vm470_vm1, %v3865_v43, %v479_v54  ;;  %5294 = vst [vmem:[#allocation7_spill] sm:$0xff] %v3921_v49 }
  0x46   : > { %418 = vrot.lane.b32.xlu1 %v351_v3, %s3585_s20  ;;  %v359_v3 = vrot.slane %v3885_v62, 1 }
  0x47   : > { %551 = vrot.lane.b32.xlu0 %v473_v8, %s3586_s21  ;;  %v533_v8 = vsel %vm470_vm1, %v531_v60, %v532_v56  ;;  %v538_v56 = vsel %vm470_vm1, %v536_v45, %v537_v35  ;;  %v241_v60 = vld [vmem:[%s3631_s19 + $0x160] sm:$0x3] }
  0x48   : > { %v361_v17 = vsel %vm293_vm0, %v359_v3, %v360_v6  ;;  %v367_v3 = vrot.slane %v241_v60, 1 }
  0x4a   : > { %420 = vrot.lane.b32.xlu1 %v353_v13, %s3585_s20  ;;  %v3898_v13 = vrot.slane %v3659_v11, 2 }
  0x4b   : > { %553 = vrot.lane.b32.xlu0 %v475_v19, %s3586_s21  ;;  %v362_v19 = vrot.slane %v238_v16, 1 }
  0x4c   : > { %v3906_v21 = vsel %vm470_vm1, %v481_v9, %v3898_v13 }
  0x4d   : > { %v363_v33 = vsel %vm293_vm0, %v360_v6, %v362_v19 }
  0x4e   : > { %597 = vrot.lane.b32.xlu1 %v530_v10, %s3586_s21  ;;  %v484_v10 = vrot.slane %v3667_v14, 2 }
  0x4f   : > { %595 = vrot.lane.b32.xlu0 %v528_v37, %s3586_s21  ;;  %v539_v37 = vrot.slane %v238_v16, 2  ;;  %v542_v16 = vrot.slane %v3921_v49, 2 }
  0x50   : > { %v485_v41 = vsel %vm470_vm1, %v3898_v13, %v484_v10 }
  0x51   : > { %v540_v14 = vsel %vm470_vm1, %v537_v35, %v539_v37  ;;  %v3954_v35 = vld [vmem:[%s3631_s19 + $0x170] sm:$0xff] }
  0x52   : > { %422 = vrot.lane.b32.xlu1 %v356_v47, %s3585_s20  ;;  %v3918_v47 = vld [vmem:[%s3631_s19 + $0x150] sm:$0xff]  ;;  %5296 = vst [vmem:[#allocation9_spill] sm:$0xff] %v3954_v35 }
  0x53   : > { %555 = vrot.lane.b32.xlu0 %v3873_v50, %s3586_s21  ;;  %5293 = vst [vmem:[#allocation6_spill] sm:$0xff] %v3918_v47  ;;  %v364_v54 = vrot.slane %v3918_v47, 1  ;;  %v541_v10 = vrot.slane %v3918_v47, 2 }
  0x55   : > { %v543_v45 = vsel %vm470_vm1, %v541_v10, %v542_v16  ;;  %v499_v10 = vrot.slane %v3733_v39, 2 }
  0x56   : > { %424 = vrot.lane.b32.xlu1 %v358_v55, %s3585_s20  ;;  %v365_v55 = vrot.slane %v3921_v49, 1 }
  0x57   : > { %557 = vrot.lane.b32.xlu0 %v480_v58, %s3586_s21  ;;  %v3931_v58 = vrot.slane %v3685_v22, 2 }
  0x58   : > { %v368_v9 = vsel %vm293_vm0, %v365_v55, %v367_v3 }
  0x59   : > { %v3939_v6 = vsel %vm470_vm1, %v486_v57, %v3931_v58 }
  0x5a   : > { %601 = vrot.lane.b32.xlu1 %v535_v7, %s3586_s21  ;;  %v366_v7 = vsel %vm293_vm0, %v364_v54, %v365_v55  ;;  %v3964_v54 = vrot.slane %v3707_v30, 2  ;;  %v244_v55 = vld [vmem:[%s3631_s19 + $0x178] sm:$0x3] }
  0x5b   : > { %599 = vrot.lane.b32.xlu0 %v533_v8, %s3586_s21  ;;  %v489_v8 = vrot.slane %v3688_v23, 2  ;;  %v372_v57 = vrot.slane %v244_v55, 1 }
  0x5d   : > { %v490_v19 = vsel %vm470_vm1, %v3931_v58, %v489_v8  ;;  %v547_v8 = vrot.slane %v3954_v35, 2 }
  0x5e   : > { %426 = vrot.lane.b32.xlu1 %v361_v17, %s3585_s20  ;;  %v544_v17 = vrot.slane %v241_v60, 2 }
  0x5f   : > { %559 = vrot.lane.b32.xlu0 %v3906_v21, %s3586_s21 }
  0x60   : > { %v545_v23 = vsel %vm470_vm1, %v542_v16, %v544_v17 }
  0x62   : > { %428 = vrot.lane.b32.xlu1 %v363_v33, %s3585_s20  ;;  %v3951_v33 = vld [vmem:[%s3631_s19 + $0x168] sm:$0xff] }
  0x63   : > { %561 = vrot.lane.b32.xlu0 %v485_v41, %s3586_s21  ;;  %5295 = vst [vmem:[#allocation8_spill] sm:$0xff] %v3951_v33  ;;  %v369_v37 = vrot.slane %v3951_v33, 1  ;;  %v370_v41 = vrot.slane %v3954_v35, 1  ;;  %v546_v17 = vrot.slane %v3951_v33, 2 }
  0x65   : > { %v373_v3 = vsel %vm293_vm0, %v370_v41, %v372_v57  ;;  %v4012_v57 = vld [vmem:[%s3631_s19 + $0x98] sm:$0xff] }
  0x66   : > { %605 = vrot.lane.b32.xlu1 %v540_v14, %s3586_s21  ;;  %v491_v14 = vrot.slane %v3713_v32, 2  ;;  %5298 = vst [vmem:[#allocation11_spill] sm:$0xff] %v4012_v57 }
  0x67   : > { %603 = vrot.lane.b32.xlu0 %v538_v56, %s3586_s21  ;;  %v371_v56 = vsel %vm293_vm0, %v369_v37, %v370_v41  ;;  %v496_v37 = vrot.slane %v3736_v40, 2  ;;  %v3091_v41 = vld [vmem:[%s3631_s19 + $0x28] sm:$0x3]  ;;  %v220_v40 = vld [vmem:[%s3631_s19 + $0xb8] sm:$0x3] }
  0x68   : > { %v3972_v60 = vsel %vm470_vm1, %v491_v14, %v3964_v54 }
  0x6a   : > { %430 = vrot.lane.b32.xlu1 %v366_v7, %s3585_s20  ;;  %v494_v7 = vrot.slane %v3710_v31, 2 }
  0x6b   : > { %563 = vrot.lane.b32.xlu0 %v3939_v6, %s3586_s21 }
  0x6c   : > { %v495_v16 = vsel %vm470_vm1, %v3964_v54, %v494_v7 }
  0x6e   : > { %432 = vrot.lane.b32.xlu1 %v368_v9, %s3585_s20  ;;  %v549_v9 = vrot.slane %v244_v55, 2  ;;  %v1182_v55 = vrot.slane %v3091_v41, 1 }
  0x6f   : > { %565 = vrot.lane.b32.xlu0 %v490_v19, %s3586_s21  ;;  %v3987_v19 = vrot.slane %v3730_v38, 2 }
  0x70   : > { %v550_v31 = vsel %vm470_vm1, %v547_v8, %v549_v9  ;;  %v1183_v7 = vsel %vm293_vm0, %v3644_v4, %v1182_v55  ;;  %v217_v9 = vld [vmem:[%s3631_s19 + $0xa0] sm:$0x3]  ;;  %v1358_v4 = vrot.slane %v3091_v41, 2 }
  0x71   : > { %v500_v14 = vsel %vm470_vm1, %v3987_v19, %v499_v10  ;;  %v4006_v39 = vsel %vm470_vm1, %v496_v37, %v3987_v19  ;;  %v504_v37 = vrot.slane %v217_v9, 2 }
  0x72   : > { %609 = vrot.lane.b32.xlu1 %v545_v23, %s3586_s21  ;;  %v548_v23 = vsel %vm470_vm1, %v546_v17, %v547_v8  ;;  %v4021_v8 = vrot.slane %v4012_v57, 1  ;;  %v327_v17 = vrot.slane %v217_v9, 1  ;;  %v1359_v41 = vsel %vm470_vm1, %v3865_v43, %v1358_v4  ;;  %v4063_v43 = vld [vmem:[%s3631_s19 + $0xa8] sm:$0xff]  ;;  %v4066_v4 = vld [vmem:[%s3631_s19 + $0xb0] sm:$0xff] }
  0x73   : > { %607 = vrot.lane.b32.xlu0 %v543_v45, %s3586_s21  ;;  %v3997_v45 = vld [vmem:[%s5270_s1 + $0x18] sm:$0xf]  ;;  %5299 = vst [vmem:[#allocation12_spill] sm:$0xff] %v4063_v43  ;;  %5300 = vst [vmem:[#allocation13_spill] sm:$0xff] %v4066_v4  ;;  %v4102_v32 = vrot.slane %v4066_v4, 2 }
  0x74   : > { %3412 = vmatprep.subr.msk.mxu1 %vm819_vm2, %v3997_v45 }
  0x75   : > { %5303 = vst [vmem:[#allocation16_spill] sm:$0xff] %v4102_v32 }
  0x76   : > { %434 = vrot.lane.b32.xlu1 %v371_v56, %s3585_s20  ;;  %v4009_v56 = vld [vmem:[%s3631_s19 + $0x90] sm:$0xff] }
  0x77   : > { %567 = vrot.lane.b32.xlu0 %v3972_v60, %s3586_s21  ;;  %5297 = vst [vmem:[#allocation10_spill] sm:$0xff] %v4009_v56  ;;  %v501_v55 = vrot.slane %v4009_v56, 2 }
  0x7a   : > { %436 = vrot.lane.b32.xlu1 %v373_v3, %s3585_s20  ;;  %v324_v3 = vrot.slane %v4009_v56, 1 }
  0x7b   : > { %569 = vrot.lane.b32.xlu0 %v495_v16, %s3586_s21 }
  0x7c   : > { %v4029_v16 = vsel %vm293_vm0, %v324_v3, %v4021_v8 }
  0x7e   : > { %613 = vrot.lane.b32.xlu1 %v550_v31, %s3586_s21 }
  0x7f   : > { %611 = vrot.lane.b32.xlu0 %v548_v23, %s3586_s21  ;;  %v4042_v23 = vrot.slane %v4012_v57, 2 }
  0x81   : > { %v4060_v57 = vsel %vm470_vm1, %v501_v55, %v4042_v23 }
  0x82   : > { %573 = vrot.lane.b32.xlu1 %v500_v14, %s3586_s21 }
  0x83   : > { %571 = vrot.lane.b32.xlu0 %v4006_v39, %s3586_s21 }
  0x86   : > { %1261 = vrot.lane.b32.xlu1 %v1183_v7, %s3585_s20  ;;  %v3094_v7 = vld [vmem:[%s3631_s19 + $0x40] sm:$0x3] }
  0x87   : > { %1259 = vrot.lane.b32.xlu0 %v3663_v12, %s3585_s20  ;;  %v328_v12 = vsel %vm293_vm0, %v4021_v8, %v327_v17  ;;  %v1187_v17 = vrot.slane %v3094_v7, 1  ;;  %v1363_v35 = vrot.slane %v3094_v7, 2 }
  0x88   : > { %v4031_v31 = vpop.permute.xlu1 %378 }
  0x89   : > { %v4033_v10 = vpop.permute.xlu0 %374  ;;  %v1364_v7 = vsel %vm470_vm1, %v3898_v13, %v1363_v35 }
  0x8a   : > { %398 = vrot.lane.b32.xlu1 %v4029_v16, %s3585_s20 }
  0x8b   : > { %1435 = vrot.lane.b32.xlu0 %v3873_v50, %s3586_s21  ;;  %v505_v50 = vsel %vm470_vm1, %v4042_v23, %v504_v37  ;;  %v329_v37 = vrot.slane %v4063_v43, 1 }
  0x8c   : > { %v4044_v14 = vpop.permute.xlu1 %380 }
  0x8d   : > { %v4050_v3 = vpop.permute.xlu0 %376 }
  0x8e   : > { %400 = vrot.lane.b32.xlu1 %v328_v12, %s3585_s20  ;;  %v1188_v12 = vsel %vm293_vm0, %v3679_v18, %v1187_v17  ;;  %v332_v17 = vrot.slane %v220_v40, 1 }
  0x8f   : > { %1437 = vrot.lane.b32.xlu0 %v1359_v41, %s3586_s21  ;;  %v4077_v41 = vrot.slane %v4066_v4, 1 }
  0x90   : > { %v4056_v9 = vpop.permute.xlu1 %384 }
  0x91   : > { %v4068_v56 = vpop.permute.xlu0 %382 }
  0x92   : > { %577 = vrot.lane.b32.xlu1 %v505_v50, %s3586_s21  ;;  %v4089_v50 = vsel %vm293_vm0, %v329_v37, %v4077_v41  ;;  %v509_v37 = vrot.slane %v220_v40, 2 }
  0x93   : > { %575 = vrot.lane.b32.xlu0 %v4060_v57, %s3586_s21 }
  0x94   : > { %v4079_v55 = vpop.permute.xlu1 %388 }
  0x95   : > { %v4082_v38 = vpop.permute.xlu0 %386 }
  0x96   : > { %1265 = vrot.lane.b32.xlu1 %v1188_v12, %s3585_s20  ;;  %v333_v12 = vsel %vm293_vm0, %v4077_v41, %v332_v17  ;;  %v510_v17 = vsel %vm470_vm1, %v4102_v32, %v509_v37 }
  0x97   : > { %1263 = vrot.lane.b32.xlu0 %v3703_v28, %s3585_s20 }
  0x98   : > { %v4091_v33 = vpop.permute.xlu1 %392 }
  0x99   : > { %5301 = vst [vmem:[#allocation14_spill] sm:$0xff] %v4091_v33  ;;  %v4093_v30 = vpop.permute.xlu0 %390  ;;  %v506_v33 = vrot.slane %v4063_v43, 2 }
  0x9a   : > { %5302 = vst [vmem:[#allocation15_spill] sm:$0xff] %v4093_v30  ;;  %402 = vrot.lane.b32.xlu1 %v4089_v50, %s3585_s20  ;;  %v3097_v30 = vld [vmem:[%s3631_s19 + $0x58] sm:$0x3] }
  0x9b   : > { %1439 = vrot.lane.b32.xlu0 %v3906_v21, %s3586_s21  ;;  %v1192_v4 = vrot.slane %v3097_v30, 1 }
  0x9c   : > { %v4104_v47 = vpop.permute.xlu1 %396 }
  0x9d   : > { %5304 = vst [vmem:[#allocation17_spill] sm:$0xff] %v4104_v47  ;;  %v4110_v49 = vpop.permute.xlu0 %394  ;;  %v4118_v47 = vsel %vm470_vm1, %v506_v33, %v4102_v32 }
  0x9e   : > { %5305 = vst [vmem:[#allocation18_spill] sm:$0xff] %v4110_v49  ;;  %404 = vrot.lane.b32.xlu1 %v333_v12, %s3585_s20  ;;  %5306 = vst [vmem:[#allocation19_spill] sm:$0xff] %v4118_v47  ;;  %v1193_v12 = vsel %vm293_vm0, %v3698_v26, %v1192_v4  ;;  %v3174_v49 = vld [vmem:[%s3631_s19 + $0x40] sm:$0x3] }
  0x9f   : > { %1441 = vrot.lane.b32.xlu0 %v1364_v7, %s3586_s21  ;;  %v1368_v7 = vrot.slane %v3097_v30, 2  ;;  %v4136_v30 = vld [vmem:[%s5270_s1 + $0x28] sm:$0xf] }
  0xa0   : > { %v409_v40 = vpop.permute.xlu1 %408  ;;  %3464 = vmatprep.subr.msk.mxu0 %vm819_vm2, %v4136_v30 }
  0xa1   : > { %v407_v35 = vpop.permute.xlu0 %406  ;;  %v665_v37 = vsel %vm647_vm4, %v3753_v46, %v409_v40  ;;  %v1369_v46 = vsel %vm470_vm1, %v3931_v58, %v1368_v7 }
  0xa2   : > { %581 = vrot.lane.b32.xlu1 %v510_v17, %s3586_s21  ;;  %v664_v33 = vsel %vm647_vm4, %v3757_v48, %v407_v35  ;;  %v2120_v48 = vrot.slane %v3174_v49, 1 }
  0xa3   : > { %579 = vrot.lane.b32.xlu0 %v4118_v47, %s3586_s21 }
  0xa4   : > { %v586_v43 = vpop.permute.xlu1 %585 }
  0xa5   : > { %v698_v17 = vsel %vm680_vm3, %v665_v37, %v586_v43  ;;  %v584_v32 = vpop.permute.xlu0 %583  ;;  %v3137_v43 = vld [vmem:[%s5270_s1 + $0x10] sm:$0xff] }
  0xa6   : > { %1269 = vrot.lane.b32.xlu1 %v1193_v12, %s3585_s20  ;;  %v697_v47 = vsel %vm680_vm3, %v664_v33, %v584_v32  ;;  %v3100_v12 = vld [vmem:[%s3631_s19 + $0x70] sm:$0x3] }
  0xa7   : > { %1267 = vrot.lane.b32.xlu0 %v3726_v36, %s3585_s20  ;;  %3388 = vmatprep.mubr.msk.f32.mxu1 %vm722_vm5, %v697_v47  ;;  %v2121_v47 = vsel %vm293_vm0, %v3679_v18, %v2120_v48  ;;  %v1197_v18 = vrot.slane %v3100_v12, 1  ;;  %v1373_v48 = vrot.slane %v3100_v12, 2 }
  0xa8   : > { %3389 = vmatmul.mubr.msk.f32.vlgmr.msra.gmra.mxu1 %vm722_vm5, %v698_v17  ;;  %v413_v32 = vpop.permute.xlu1 %412  ;;  %v2296_v17 = vrot.slane %v3174_v49, 2 }
  0xa9   : > { %v411_v4 = vpop.permute.xlu0 %410  ;;  %3413 = vmatpush3.msk.msra.mxu1 %vm819_vm2, %v3997_v45  ;;  %v667_v40 = vsel %vm647_vm4, %v3778_v59, %v413_v32 }
  0xaa   : > { %1445 = vrot.lane.b32.xlu1 %v1369_v46, %s3586_s21  ;;  %3414 = vmatprep.subr.mxu1 %v3137_v43  ;;  %v666_v7 = vsel %vm647_vm4, %v3782_v61, %v411_v4  ;;  %v1198_v61 = vsel %vm293_vm0, %v3721_v34, %v1197_v18  ;;  %v2297_v32 = vsel %vm470_vm1, %v3898_v13, %v2296_v17  ;;  %v3177_v4 = vld [vmem:[%s3631_s19 + $0x58] sm:$0x3] }
  0xab   : > { %1443 = vrot.lane.b32.xlu0 %v3939_v6, %s3586_s21  ;;  %3415 = vmatpush3.msra.mxu1 %v3137_v43  ;;  %v2125_v13 = vrot.slane %v3177_v4, 1  ;;  %v649_v18 = vsel %vm647_vm4, %v3647_v5, %v4050_v3  ;;  %v2301_v5 = vrot.slane %v3177_v4, 2 }
  0xac   : > { %v590_v35 = vpop.permute.xlu1 %589 }
  0xad   : > { %v700_v45 = vsel %vm680_vm3, %v667_v40, %v590_v35  ;;  %v588_v37 = vpop.permute.xlu0 %587 }
  0xae   : > { %v699_v33 = vsel %vm680_vm3, %v666_v7, %v588_v37  ;;  %2199 = vrot.lane.b32.xlu1 %v2121_v47, %s3585_s20 }
  0xaf   : > { %2197 = vrot.lane.b32.xlu0 %v3703_v28, %s3585_s20  ;;  %3391 = vmatprep.mubr.msk.f32.mxu1 %vm722_vm5, %v699_v33  ;;  %v3103_v33 = vld [vmem:[%s3631_s19 + $0x88] sm:$0x3] }
  0xb0   : > { %3392 = vmatmul.mubr.msk.f32.gmra.mxu1 %vm722_vm5, %v700_v45  ;;  %v417_v59 = vpop.permute.xlu1 %416  ;;  %v2126_v45 = vsel %vm293_vm0, %v3698_v26, %v2125_v13  ;;  %v1202_v26 = vrot.slane %v3103_v33, 1 }
  0xb1   : > { %v415_v46 = vpop.permute.xlu0 %414  ;;  %v669_v28 = vsel %vm647_vm4, %v3797_v20, %v417_v59  ;;  %v1374_v20 = vsel %vm470_vm1, %v3964_v54, %v1373_v48  ;;  %v3220_v59 = vld [vmem:[%s5270_s1 + $0x20] sm:$0xff] }
  0xb2   : > { %1271 = vrot.lane.b32.xlu1 %v3749_v44, %s3585_s20  ;;  %v668_v49 = vsel %vm647_vm4, %v3801_v25, %v415_v46  ;;  %v648_v25 = vsel %vm647_vm4, %v3640_v2, %v4033_v10 }
  0xb3   : > { %2373 = vrot.lane.b32.xlu0 %v3906_v21, %s3586_s21 }
  0xb4   : > { %v594_v43 = vpop.permute.xlu1 %593 }
  0xb5   : > { %v702_v47 = vsel %vm680_vm3, %v669_v28, %v594_v43  ;;  %v592_v40 = vpop.permute.xlu0 %591  ;;  %v2302_v28 = vsel %vm470_vm1, %v3931_v58, %v2301_v5  ;;  %v3180_v43 = vld [vmem:[%s3631_s19 + $0x70] sm:$0x3] }
  0xb6   : > { %v701_v21 = vsel %vm680_vm3, %v668_v49, %v592_v40  ;;  %1273 = vrot.lane.b32.xlu1 %v1198_v61, %s3585_s20  ;;  %v651_v40 = vsel %vm647_vm4, %v3637_v1, %v4044_v14 }
  0xb7   : > { %2375 = vrot.lane.b32.xlu0 %v2297_v32, %s3586_s21  ;;  %3394 = vmatprep.mubr.msk.f32.mxu1 %vm722_vm5, %v701_v21  ;;  %v650_v32 = vsel %vm647_vm4, %v3634_v0, %v4031_v31 }
  0xb8   : > { %3395 = vmatmul.mubr.msk.f32.gmra.mxu1 %vm722_vm5, %v702_v47  ;;  %v419_v35 = vpop.permute.xlu1 %418  ;;  %v2130_v47 = vrot.slane %v3180_v43, 1 }
  0xb9   : > { %v552_v12 = vpop.permute.xlu0 %551  ;;  %v670_v3 = vsel %vm647_vm4, %v3819_v51, %v419_v35  ;;  %v3106_v35 = vld [vmem:[%s3631_s19 + $0xa0] sm:$0x3] }
  0xba   : > { %1449 = vrot.lane.b32.xlu1 %v1374_v20, %s3586_s21  ;;  %v681_v7 = vsel %vm680_vm3, %v648_v25, %v552_v12  ;;  %v2131_v21 = vsel %vm293_vm0, %v3721_v34, %v2130_v47  ;;  %v1207_v34 = vrot.slane %v3106_v35, 1 }
  0xbb   : > { %1447 = vrot.lane.b32.xlu0 %v3972_v60, %s3586_s21  ;;  %3364 = vmatprep.mubr.msk.f32.mxu0 %vm722_vm5, %v681_v7  ;;  %v2306_v7 = vrot.slane %v3180_v43, 2  ;;  %v5307_v43 = vld [vmem:[#allocation7_spill] sm:$0xff] }
  0xbc   : > { %v421_v37 = vpop.permute.xlu1 %420 }
  0xbd   : > { %v554_v2 = vpop.permute.xlu0 %553  ;;  %v671_v17 = vsel %vm647_vm4, %v3822_v53, %v421_v37  ;;  %v1203_v53 = vsel %vm293_vm0, %v3744_v42, %v1202_v26 }
  0xbe   : > { %v682_v10 = vsel %vm680_vm3, %v649_v18, %v554_v2  ;;  %2203 = vrot.lane.b32.xlu1 %v2126_v45, %s3585_s20  ;;  %v2307_v2 = vsel %vm470_vm1, %v3964_v54, %v2306_v7 }
  0xbf   : > { %2201 = vrot.lane.b32.xlu0 %v3726_v36, %s3585_s20  ;;  %3365 = vmatmul.mubr.msk.f32.vlgmr.msra.gmra.mxu0 %vm722_vm5, %v682_v10 }
  0xc0   : > { %v598_v46 = vpop.permute.xlu1 %597  ;;  %3465 = vmatpush3.msk.msra.mxu0 %vm819_vm2, %v4136_v30  ;;  %v1378_v30 = vrot.slane %v3103_v33, 2  ;;  %v1383_v33 = vrot.slane %v3106_v35, 2  ;;  %v5311_v35 = vld [vmem:[#allocation3_spill] sm:$0xff] }
  0xc1   : > { %v704_v61 = vsel %vm680_vm3, %v671_v17, %v598_v46  ;;  %v596_v48 = vpop.permute.xlu0 %595  ;;  %3466 = vmatprep.subr.mxu0 %v3220_v59 }
  0xc2   : > { %v703_v36 = vsel %vm680_vm3, %v670_v3, %v596_v48  ;;  %1275 = vrot.lane.b32.xlu1 %v3767_v52, %s3585_s20  ;;  %3467 = vmatpush3.msra.mxu0 %v3220_v59  ;;  %v1379_v49 = vsel %vm470_vm1, %v3987_v19, %v1378_v30 }
  0xc3   : > { %2377 = vrot.lane.b32.xlu0 %v3939_v6, %s3586_s21  ;;  %3397 = vmatprep.mubr.msk.f32.mxu1 %vm722_vm5, %v703_v36 }
  0xc4   : > { %3398 = vmatmul.mubr.msk.f32.gmra.mxu1 %vm722_vm5, %v704_v61  ;;  %v423_v51 = vpop.permute.xlu1 %422  ;;  %v3109_v61 = vld [vmem:[%s3631_s19 + $0xb8] sm:$0x3] }
  0xc5   : > { %v556_v4 = vpop.permute.xlu0 %555  ;;  %v672_v1 = vsel %vm647_vm4, %v3852_v27, %v423_v51  ;;  %v652_v27 = vsel %vm647_vm4, %v3670_v15, %v4068_v56  ;;  %v3183_v15 = vld [vmem:[%s3631_s19 + $0x88] sm:$0x3]  ;;  %v653_v56 = vsel %vm647_vm4, %v3659_v11, %v4056_v9  ;;  %v655_v51 = vsel %vm647_vm4, %v3685_v22, %v4079_v55 }
  0xc6   : > { %v683_v6 = vsel %vm680_vm3, %v650_v32, %v556_v4  ;;  %1277 = vrot.lane.b32.xlu1 %v1203_v53, %s3585_s20  ;;  %v2135_v26 = vrot.slane %v3183_v15, 1  ;;  %v2311_v30 = vrot.slane %v3183_v15, 2  ;;  %v3186_v4 = vld [vmem:[%s3631_s19 + $0xa0] sm:$0x3] }
  0xc7   : > { %2379 = vrot.lane.b32.xlu0 %v2302_v28, %s3586_s21  ;;  %3367 = vmatprep.mubr.msk.f32.mxu0 %vm722_vm5, %v683_v6  ;;  %v5308_v6 = vld [vmem:[#allocation6_spill] sm:$0xff] }
  0xc8   : > { %v425_v58 = vpop.permute.xlu1 %424  ;;  %v2136_v3 = vsel %vm293_vm0, %v3744_v42, %v2135_v26  ;;  %v1212_v42 = vrot.slane %v3109_v61, 1  ;;  %v2312_v55 = vsel %vm470_vm1, %v3987_v19, %v2311_v30  ;;  %v2140_v19 = vrot.slane %v3186_v4, 1  ;;  %v5316_v26 = vld [vmem:[#allocation8_spill] sm:$0xff] }
  0xc9   : > { %v558_v0 = vpop.permute.xlu0 %557  ;;  %v673_v20 = vsel %vm647_vm4, %v3855_v29, %v425_v58 }
  0xca   : > { %v684_v31 = vsel %vm680_vm3, %v651_v40, %v558_v0  ;;  %1453 = vrot.lane.b32.xlu1 %v1379_v49, %s3586_s21  ;;  %v5309_v40 = vld [vmem:[#allocation16_spill] sm:$0xff] }
  0xcb   : > { %1451 = vrot.lane.b32.xlu0 %v4006_v39, %s3586_s21  ;;  %3368 = vmatmul.mubr.msk.f32.gmra.mxu0 %vm722_vm5, %v684_v31 }
  0xcc   : > { %v602_v13 = vpop.permute.xlu1 %601 }
  0xcd   : > { %v706_v14 = vsel %vm680_vm3, %v673_v20, %v602_v13  ;;  %v600_v25 = vpop.permute.xlu0 %599  ;;  %v4336_v20 = vld [vmem:[%s3631_s19 + $0xc8] sm:$0xff] }
  0xce   : > { %v705_v12 = vsel %vm680_vm3, %v672_v1, %v600_v25  ;;  %2207 = vrot.lane.b32.xlu1 %v2131_v21, %s3585_s20  ;;  %v4333_v21 = vld [vmem:[%s3631_s19 + $0xc0] sm:$0xff]  ;;  %v5310_v13 = vld [vmem:[#allocation15_spill] sm:$0xff]  ;;  %v4350_v7 = vrot.slane %v4336_v20, 1 }
  0xcf   : > { %2205 = vrot.lane.b32.xlu0 %v3749_v44, %s3585_s20  ;;  %3400 = vmatprep.mubr.msk.f32.mxu1 %vm722_vm5, %v705_v12  ;;  %v1208_v44 = vsel %vm293_vm0, %v4021_v8, %v1207_v34  ;;  %v656_v1 = vsel %vm647_vm4, %v5311_v35, %v5310_v13  ;;  %v5312_v12 = vld [vmem:[#allocation19_spill] sm:$0xff]  ;;  %v2141_v34 = vsel %vm293_vm0, %v4021_v8, %v2140_v19 }
  0xd0   : > { %3401 = vmatmul.mubr.msk.f32.gmra.mxu1 %vm722_vm5, %v706_v14  ;;  %v427_v29 = vpop.permute.xlu1 %426 }
  0xd1   : > { %v560_v45 = vpop.permute.xlu0 %559  ;;  %v674_v11 = vsel %vm647_vm4, %v3885_v62, %v427_v29  ;;  %v654_v62 = vsel %vm647_vm4, %v3691_v24, %v4082_v38  ;;  %v1213_v38 = vsel %vm293_vm0, %v4077_v41, %v1212_v42  ;;  %v1214_v29 = vrot.slane %v4333_v21, 1  ;;  %v5319_v42 = vld [vmem:[#allocation18_spill] sm:$0xff] }
  0xd2   : > { %v685_v37 = vsel %vm680_vm3, %v652_v27, %v560_v45  ;;  %1279 = vrot.lane.b32.xlu1 %v4029_v16, %s3585_s20  ;;  %v3112_v45 = vld [vmem:[%s3631_s19 + $0xd0] sm:$0x3] }
  0xd3   : > { %2381 = vrot.lane.b32.xlu0 %v3972_v60, %s3586_s21  ;;  %3370 = vmatprep.mubr.msk.f32.mxu0 %vm722_vm5, %v685_v37  ;;  %v1384_v60 = vsel %vm470_vm1, %v4042_v23, %v1383_v33  ;;  %v5313_v37 = vld [vmem:[#allocation14_spill] sm:$0xff]  ;;  %v4363_v8 = vsel %vm293_vm0, %v1214_v29, %v4350_v7  ;;  %v1217_v15 = vrot.slane %v3112_v45, 1 }
  0xd4   : > { %v429_v18 = vpop.permute.xlu1 %428 }
  0xd5   : > { %v562_v10 = vpop.permute.xlu0 %561  ;;  %v675_v54 = vsel %vm647_vm4, %v3888_v63, %v429_v18 }
  0xd6   : > { %v686_v59 = vsel %vm680_vm3, %v653_v56, %v562_v10  ;;  %1281 = vrot.lane.b32.xlu1 %v1208_v44, %s3585_s20  ;;  %v5314_v44 = vld [vmem:[#allocation2_spill] sm:$0xff]  ;;  %v5315_v56 = vld [vmem:[#allocation9_spill] sm:$0xff] }
  0xd7   : > { %2383 = vrot.lane.b32.xlu0 %v2307_v2, %s3586_s21  ;;  %3371 = vmatmul.mubr.msk.f32.gmra.mxu0 %vm722_vm5, %v686_v59  ;;  %v657_v33 = vsel %vm647_vm4, %v5314_v44, %v5313_v37  ;;  %v5321_v37 = vld [vmem:[#allocation11_spill] sm:$0xff] }
  0xd8   : > { %v606_v17 = vpop.permute.xlu1 %605 }
  0xd9   : > { %v708_v9 = vsel %vm680_vm3, %v675_v54, %v606_v17  ;;  %v604_v46 = vpop.permute.xlu0 %603 }
  0xda   : > { %v707_v5 = vsel %vm680_vm3, %v674_v11, %v604_v46  ;;  %1457 = vrot.lane.b32.xlu1 %v1384_v60, %s3586_s21  ;;  %v2316_v60 = vrot.slane %v3186_v4, 2  ;;  %v4379_v46 = vrot.slane %v4336_v20, 2 }
  0xdb   : > { %1455 = vrot.lane.b32.xlu0 %v4060_v57, %s3586_s21  ;;  %3403 = vmatprep.mubr.msk.f32.mxu1 %vm722_vm5, %v707_v5  ;;  %v1393_v5 = vrot.slane %v3112_v45, 2 }
  0xdc   : > { %3404 = vmatmul.mubr.msk.f32.gmra.mxu1 %vm722_vm5, %v708_v9  ;;  %v431_v63 = vpop.permute.xlu1 %430  ;;  %v1218_v9 = vsel %vm293_vm0, %v4350_v7, %v1217_v15  ;;  %v5322_v15 = vld [vmem:[#allocation10_spill] sm:$0xff] }
  0xdd   : > { %v564_v48 = vpop.permute.xlu0 %563  ;;  %v676_v49 = vsel %vm647_vm4, %v5308_v6, %v431_v63  ;;  %v5318_v63 = vld [vmem:[#allocation4_spill] sm:$0xff] }
  0xde   : > { %v687_v36 = vsel %vm680_vm3, %v654_v62, %v564_v48  ;;  %2211 = vrot.lane.b32.xlu1 %v2136_v3, %s3585_s20  ;;  %v5317_v3 = vld [vmem:[#allocation17_spill] sm:$0xff]  ;;  %v1390_v48 = vrot.slane %v4333_v21, 2 }
  0xdf   : > { %2209 = vrot.lane.b32.xlu0 %v3767_v52, %s3585_s20  ;;  %3373 = vmatprep.mubr.msk.f32.mxu0 %vm722_vm5, %v687_v36  ;;  %v1388_v52 = vrot.slane %v3109_v61, 2  ;;  %v659_v61 = vsel %vm647_vm4, %v5318_v63, %v5317_v3  ;;  %v3189_v36 = vld [vmem:[%s3631_s19 + $0xb8] sm:$0x3] }
  0xe0   : > { %v433_v53 = vpop.permute.xlu1 %432 }
  0xe1   : > { %v566_v28 = vpop.permute.xlu0 %565  ;;  %v677_v32 = vsel %vm647_vm4, %v5307_v43, %v433_v53  ;;  %v1389_v0 = vsel %vm470_vm1, %v5309_v40, %v1388_v52  ;;  %v5320_v53 = vld [vmem:[#allocation5_spill] sm:$0xff]  ;;  %v4402_v43 = vsel %vm470_vm1, %v1390_v48, %v4379_v46 }
  0xe2   : > { %v688_v24 = vsel %vm680_vm3, %v655_v51, %v566_v28  ;;  %1283 = vrot.lane.b32.xlu1 %v4089_v50, %s3585_s20  ;;  %v658_v30 = vsel %vm647_vm4, %v5320_v53, %v5319_v42 }
  0xe3   : > { %2385 = vrot.lane.b32.xlu0 %v4006_v39, %s3586_s21  ;;  %3374 = vmatmul.mubr.msk.f32.gmra.mxu0 %vm722_vm5, %v688_v24 }
  0xe4   : > { %v610_v22 = vpop.permute.xlu1 %609 }
  0xe5   : > { %v710_v39 = vsel %vm680_vm3, %v677_v32, %v610_v22  ;;  %v608_v47 = vpop.permute.xlu0 %607  ;;  %v4405_v32 = vld [vmem:[%s3631_s19 + $0xd8] sm:$0xff]  ;;  %v4408_v22 = vld [vmem:[%s3631_s19 + $0xe0] sm:$0xff] }
  0xe6   : > { %v709_v58 = vsel %vm680_vm3, %v676_v49, %v608_v47  ;;  %1285 = vrot.lane.b32.xlu1 %v1213_v38, %s3585_s20  ;;  %v2145_v38 = vrot.slane %v3189_v36, 1  ;;  %v1219_v6 = vrot.slane %v4405_v32, 1  ;;  %v4417_v49 = vrot.slane %v4408_v22, 1  ;;  %v3115_v47 = vld [vmem:[%s3631_s19 + $0xe8] sm:$0x3] }
  0xe7   : > { %2387 = vrot.lane.b32.xlu0 %v2312_v55, %s3586_s21  ;;  %3406 = vmatprep.mubr.msk.f32.mxu1 %vm722_vm5, %v709_v58  ;;  %v3547_v58 = vld [vmem:[%s3631_s19 + $0x18] sm:$0xff]  ;;  %v1222_v13 = vrot.slane %v3115_v47, 1  ;;  %v1398_v45 = vrot.slane %v3115_v47, 2 }
  0xe8   : > { %3407 = vmatmul.mubr.msk.f32.gmra.mxu1 %vm722_vm5, %v710_v39  ;;  %v435_v31 = vpop.permute.xlu1 %434  ;;  %v2146_v4 = vsel %vm293_vm0, %v4077_v41, %v2145_v38  ;;  %v4429_v41 = vsel %vm293_vm0, %v1219_v6, %v4417_v49 }
  0xe9   : > { %v568_v14 = vpop.permute.xlu0 %567  ;;  %v678_v54 = vsel %vm647_vm4, %v5316_v26, %v435_v31 }
  0xea   : > { %v689_v25 = vsel %vm680_vm3, %v656_v1, %v568_v14  ;;  %1461 = vrot.lane.b32.xlu1 %v1389_v0, %s3586_s21  ;;  %v2321_v1 = vrot.slane %v3189_v36, 2  ;;  %v3548_v14 = vld [vmem:[%s3631_s19 + $0x20] sm:$0xff] }
  0xeb   : > { %1459 = vrot.lane.b32.xlu0 %v5312_v12, %s3586_s21  ;;  %3376 = vmatprep.mubr.msk.f32.mxu0 %vm722_vm5, %v689_v25 }
  0xec   : > { %v437_v27 = vpop.permute.xlu1 %436 }
  0xed   : > { %v570_v18 = vpop.permute.xlu0 %569  ;;  %v679_v10 = vsel %vm647_vm4, %v5315_v56, %v437_v27  ;;  %v4442_v27 = vrot.slane %v4408_v22, 2 }
  0xee   : > { %v690_v2 = vsel %vm680_vm3, %v657_v33, %v570_v18  ;;  %2215 = vrot.lane.b32.xlu1 %v2141_v34, %s3585_s20  ;;  %v2322_v18 = vsel %vm470_vm1, %v5309_v40, %v2321_v1 }
  0xef   : > { %2213 = vrot.lane.b32.xlu0 %v4029_v16, %s3585_s20  ;;  %3377 = vmatmul.mubr.msk.f32.gmra.mxu0 %vm722_vm5, %v690_v2  ;;  %v3192_v2 = vld [vmem:[%s3631_s19 + $0xd0] sm:$0x3]  ;;  %v1399_v40 = vsel %vm470_vm1, %v4442_v27, %v1398_v45 }
  0xf0   : > { %v614_v59 = vpop.permute.xlu1 %613  ;;  %v2150_v26 = vrot.slane %v3192_v2, 1 }
  0xf1   : > { %v712_v17 = vsel %vm680_vm3, %v679_v10, %v614_v59  ;;  %v612_v11 = vpop.permute.xlu0 %611 }
  0xf2   : > { %v711_v16 = vsel %vm680_vm3, %v678_v54, %v612_v11  ;;  %1287 = vrot.lane.b32.xlu1 %v4363_v8, %s3585_s20  ;;  %v4465_v11 = vld [vmem:[%s3631_s19 + $0xf0] sm:$0xff] }
  0xf3   : > { %2389 = vrot.lane.b32.xlu0 %v4060_v57, %s3586_s21  ;;  %3409 = vmatprep.mubr.msk.f32.mxu1 %vm722_vm5, %v711_v16  ;;  %v2317_v57 = vsel %vm470_vm1, %v4042_v23, %v2316_v60  ;;  %v1394_v23 = vsel %vm470_vm1, %v4379_v46, %v1393_v5  ;;  %v4468_v16 = vld [vmem:[%s3631_s19 + $0xf8] sm:$0xff]  ;;  %v2151_v5 = vsel %vm293_vm0, %v4350_v7, %v2150_v26  ;;  %v1224_v3 = vrot.slane %v4465_v11, 1 }
  0xf4   : > { %3410 = vmatmul.mubr.msk.f32.gmra.mxu1 %vm722_vm5, %v712_v17  ;;  %v574_v62 = vpop.permute.xlu1 %573  ;;  %v4477_v63 = vrot.slane %v4468_v16, 1 }
  0xf5   : > { %v692_v51 = vsel %vm680_vm3, %v659_v61, %v574_v62  ;;  %v572_v28 = vpop.permute.xlu0 %571  ;;  %v3118_v62 = vld [vmem:[%s3631_s19 + $0x100] sm:$0x3] }
  0xf6   : > { %v691_v24 = vsel %vm680_vm3, %v658_v30, %v572_v28  ;;  %1289 = vrot.lane.b32.xlu1 %v1218_v9, %s3585_s20  ;;  %v4492_v7 = vsel %vm293_vm0, %v1224_v3, %v4477_v63  ;;  %v1227_v53 = vrot.slane %v3118_v62, 1  ;;  %v4495_v28 = vld [vmem:[%s3631_s19 + $0x38] sm:$0xff] }
  0xf7   : > { %2391 = vrot.lane.b32.xlu0 %v2317_v57, %s3586_s21  ;;  %3379 = vmatprep.mubr.msk.f32.mxu0 %vm722_vm5, %v691_v24  ;;  %v4481_v57 = vld [vmem:[%s3631_s19 + $0x30] sm:$0xff] }
  0xf8   : > { %3380 = vmatmul.mubr.msk.f32.gmra.mxu0 %vm722_vm5, %v692_v51  ;;  %v1262_v52 = vpop.permute.xlu1 %1261  ;;  %v2326_v51 = vrot.slane %v3192_v2, 2  ;;  %v3121_v2 = vld [vmem:[%s3631_s19 + $0x118] sm:$0x3] }
  0xf9   : > { %v1260_v55 = vpop.permute.xlu0 %1259  ;;  %v1532_v25 = vsel %vm647_vm4, %v3548_v14, %v1262_v52  ;;  %v4508_v52 = vrot.slane %v4468_v16, 2  ;;  %v1408_v3 = vrot.slane %v3121_v2, 2 }
  0xfa   : > { %1465 = vrot.lane.b32.xlu1 %v1394_v23, %s3586_s21  ;;  %v1531_v0 = vsel %vm647_vm4, %v3547_v58, %v1260_v55  ;;  %v1403_v55 = vrot.slane %v3118_v62, 2  ;;  %v2327_v47 = vsel %vm470_vm1, %v4379_v46, %v2326_v51  ;;  %v3195_v58 = vld [vmem:[%s3631_s19 + $0xe8] sm:$0x3] }
  0xfb   : > { %1463 = vrot.lane.b32.xlu0 %v4402_v43, %s3586_s21  ;;  %v2155_v1 = vrot.slane %v3195_v58, 1 }
  0xfc   : > { %v399_v39 = vpop.permute.xlu1 %398  ;;  %v1404_v46 = vsel %vm470_vm1, %v4508_v52, %v1403_v55 }
  0xfd   : > { %v1436_v19 = vpop.permute.xlu0 %1435  ;;  %v660_v56 = vsel %vm647_vm4, %v5322_v15, %v399_v39  ;;  %v2156_v45 = vsel %vm293_vm0, %v4417_v49, %v2155_v1  ;;  %v4552_v15 = vld [vmem:[%s3631_s19 + $0x48] sm:$0xff] }
  0xfe   : > { %v1563_v31 = vsel %vm680_vm3, %v1531_v0, %v1436_v19  ;;  %2219 = vrot.lane.b32.xlu1 %v2146_v4, %s3585_s20  ;;  %v5323_v4 = vld [vmem:[#allocation13_spill] sm:$0xff]  ;;  %v5324_v0 = vld [vmem:[#allocation12_spill] sm:$0xff] }
  0xff   : > { %2217 = vrot.lane.b32.xlu0 %v4089_v50, %s3585_s20  ;;  %3416 = vmatprep.mubr.msk.f32.mxu1 %vm722_vm5, %v1563_v31  ;;  %v1223_v50 = vsel %vm293_vm0, %v4417_v49, %v1222_v13 }
 0x100   : > { %v401_v35 = vpop.permute.xlu1 %400 }
 0x101   : > { %v1438_v34 = vpop.permute.xlu0 %1437  ;;  %v661_v44 = vsel %vm647_vm4, %v5321_v37, %v401_v35 }
 0x102   : > { %v1564_v29 = vsel %vm680_vm3, %v1532_v25, %v1438_v34  ;;  %1291 = vrot.lane.b32.xlu1 %v4429_v41, %s3585_s20  ;;  %v4531_v34 = vld [vmem:[%s3631_s19 + $0x108] sm:$0xff] }
 0x103   : > { %2393 = vrot.lane.b32.xlu0 %v5312_v12, %s3586_s21  ;;  %3417 = vmatmul.mubr.msk.f32.vlgmr.msra.gmra.mxu1 %vm722_vm5, %v1564_v29  ;;  %v1395_v12 = vrot.slane %v4405_v32, 2  ;;  %v4534_v29 = vld [vmem:[%s3631_s19 + $0x110] sm:$0xff]  ;;  %v1229_v37 = vrot.slane %v4531_v34, 1 }
 0x104   : > { %v578_v33 = vpop.permute.xlu1 %577 }
 0x105   : > { %v694_v10 = vsel %vm680_vm3, %v661_v44, %v578_v33  ;;  %v576_v59 = vpop.permute.xlu0 %575  ;;  %v4462_v17 = vsel %vm470_vm1, %v1395_v12, %v4442_v27  ;;  %v4543_v44 = vrot.slane %v4534_v29, 1  ;;  %v4546_v33 = vld [vmem:[%s3631_s19 + $0x50] sm:$0xff] }
 0x106   : > { %v693_v60 = vsel %vm680_vm3, %v660_v56, %v576_v59  ;;  %1293 = vrot.lane.b32.xlu1 %v1223_v50, %s3585_s20 }
 0x107   : > { %2395 = vrot.lane.b32.xlu0 %v2322_v18, %s3586_s21  ;;  %3382 = vmatprep.mubr.msk.f32.mxu0 %vm722_vm5, %v693_v60  ;;  %v4564_v60 = vsel %vm293_vm0, %v1229_v37, %v4543_v44 }
 0x108   : > { %3383 = vmatmul.mubr.msk.f32.gmra.mxu0 %vm722_vm5, %v694_v10  ;;  %v1266_v54 = vpop.permute.xlu1 %1265 }
 0x109   : > { %v1264_v9 = vpop.permute.xlu0 %1263  ;;  %v1534_v24 = vsel %vm647_vm4, %v4495_v28, %v1266_v54  ;;  %v2331_v54 = vrot.slane %v3195_v58, 2  ;;  %v3124_v58 = vld [vmem:[%s3631_s19 + $0x130] sm:$0x3] }
 0x10a   : > { %1469 = vrot.lane.b32.xlu1 %v1399_v40, %s3586_s21  ;;  %v1533_v48 = vsel %vm647_vm4, %v4481_v57, %v1264_v9  ;;  %v1232_v40 = vrot.slane %v3121_v2, 1  ;;  %v1413_v37 = vrot.slane %v3124_v58, 2 }
 0x10b   : > { %1467 = vrot.lane.b32.xlu0 %v4462_v17, %s3586_s21  ;;  %v2332_v62 = vsel %vm470_vm1, %v4442_v27, %v2331_v54  ;;  %v4662_v54 = vld [vmem:[%s3631_s19 + $0x140] sm:$0xff] }
 0x10c   : > { %v403_v61 = vpop.permute.xlu1 %402 }
 0x10d   : > { %v1440_v36 = vpop.permute.xlu0 %1439  ;;  %v662_v19 = vsel %vm647_vm4, %v5324_v0, %v403_v61  ;;  %v4618_v0 = vld [vmem:[%s3631_s19 + $0x60] sm:$0xff] }
 0x10e   : > { %v1565_v42 = vsel %vm680_vm3, %v1533_v48, %v1440_v36  ;;  %2223 = vrot.lane.b32.xlu1 %v2151_v5, %s3585_s20  ;;  %v4574_v5 = vrot.slane %v4534_v29, 2  ;;  %v1405_v48 = vrot.slane %v4531_v34, 2  ;;  %v3198_v36 = vld [vmem:[%s3631_s19 + $0x100] sm:$0x3] }
 0x10f   : > { %2221 = vrot.lane.b32.xlu0 %v4363_v8, %s3585_s20  ;;  %3419 = vmatprep.mubr.msk.f32.mxu1 %vm722_vm5, %v1565_v42  ;;  %v1228_v8 = vsel %vm293_vm0, %v4477_v63, %v1227_v53  ;;  %v2160_v27 = vrot.slane %v3198_v36, 1 }
 0x110   : > { %v405_v30 = vpop.permute.xlu1 %404 }
 0x111   : > { %v1442_v23 = vpop.permute.xlu0 %1441  ;;  %v663_v6 = vsel %vm647_vm4, %v5323_v4, %v405_v30  ;;  %v1409_v30 = vsel %vm470_vm1, %v4574_v5, %v1408_v3  ;;  %v2161_v4 = vsel %vm293_vm0, %v4477_v63, %v2160_v27 }
 0x112   : > { %v1566_v38 = vsel %vm680_vm3, %v1534_v24, %v1442_v23  ;;  %1295 = vrot.lane.b32.xlu1 %v4492_v7, %s3585_s20  ;;  %v4590_v24 = vsel %vm470_vm1, %v1405_v48, %v4574_v5  ;;  %v4596_v23 = vld [vmem:[%s3631_s19 + $0x128] sm:$0xff]  ;;  %v4675_v48 = vrot.slane %v4662_v54, 1 }
 0x113   : > { %2397 = vrot.lane.b32.xlu0 %v4402_v43, %s3586_s21  ;;  %3420 = vmatmul.mubr.msk.f32.gmra.mxu1 %vm722_vm5, %v1566_v38  ;;  %v1400_v43 = vrot.slane %v4465_v11, 2 }
 0x114   : > { %v582_v39 = vpop.permute.xlu1 %581 }
 0x115   : > { %v696_v31 = vsel %vm680_vm3, %v663_v6, %v582_v39  ;;  %v580_v13 = vpop.permute.xlu0 %579  ;;  %v4528_v25 = vsel %vm470_vm1, %v1400_v43, %v4508_v52  ;;  %v4609_v39 = vrot.slane %v4596_v23, 1 }
 0x116   : > { %v695_v35 = vsel %vm680_vm3, %v662_v19, %v580_v13  ;;  %1297 = vrot.lane.b32.xlu1 %v1228_v8, %s3585_s20 }
 0x117   : > { %2399 = vrot.lane.b32.xlu0 %v2327_v47, %s3586_s21  ;;  %3385 = vmatprep.mubr.msk.f32.mxu0 %vm722_vm5, %v695_v35  ;;  %v4612_v47 = vld [vmem:[%s3631_s19 + $0x68] sm:$0xff] }
 0x118   : > { %3386 = vmatmul.mubr.msk.f32.gmra.mxu0 %vm722_vm5, %v696_v31  ;;  %v1270_v14 = vpop.permute.xlu1 %1269 }
 0x119   : > { %v1268_v50 = vpop.permute.xlu0 %1267  ;;  %v1536_v18 = vsel %vm647_vm4, %v4546_v33, %v1270_v14  ;;  %v2336_v14 = vrot.slane %v3198_v36, 2  ;;  %v4678_v36 = vld [vmem:[%s3631_s19 + $0x80] sm:$0xff] }
 0x11a   : > { %1473 = vrot.lane.b32.xlu1 %v1404_v46, %s3586_s21  ;;  %v1535_v56 = vsel %vm647_vm4, %v4552_v15, %v1268_v50  ;;  %v1237_v46 = vrot.slane %v3124_v58, 1 }
 0x11b   : > { %1471 = vrot.lane.b32.xlu0 %v4528_v25, %s3586_s21 }
 0x11c   : > { %v1446_v12 = vpop.permute.xlu1 %1445 }
 0x11d   : > { %v1568_v10 = vsel %vm680_vm3, %v1536_v18, %v1446_v12  ;;  %v1444_v49 = vpop.permute.xlu0 %1443  ;;  %v2337_v12 = vsel %vm470_vm1, %v4508_v52, %v2336_v14 }
 0x11e   : > { %v1567_v59 = vsel %vm680_vm3, %v1535_v56, %v1444_v49  ;;  %2227 = vrot.lane.b32.xlu1 %v2156_v45, %s3585_s20  ;;  %v4640_v45 = vrot.slane %v4596_v23, 2  ;;  %v3201_v56 = vld [vmem:[%s3631_s19 + $0x118] sm:$0x3] }
 0x11f   : > { %2225 = vrot.lane.b32.xlu0 %v4429_v41, %s3585_s20  ;;  %3422 = vmatprep.mubr.msk.f32.mxu1 %vm722_vm5, %v1567_v59  ;;  %v1233_v41 = vsel %vm293_vm0, %v4543_v44, %v1232_v40  ;;  %v2165_v52 = vrot.slane %v3201_v56, 1 }
 0x120   : > { %3423 = vmatmul.mubr.msk.f32.gmra.mxu1 %vm722_vm5, %v1568_v10  ;;  %v2200_v26 = vpop.permute.xlu1 %2199  ;;  %v1414_v59 = vsel %vm470_vm1, %v4640_v45, %v1413_v37 }
 0x121   : > { %v2198_v9 = vpop.permute.xlu0 %2197  ;;  %v2470_v38 = vsel %vm647_vm4, %v4495_v28, %v2200_v26 }
 0x122   : > { %1299 = vrot.lane.b32.xlu1 %v4564_v60, %s3585_s20  ;;  %v2469_v42 = vsel %vm647_vm4, %v4481_v57, %v2198_v9  ;;  %v4593_v57 = vld [vmem:[%s3631_s19 + $0x120] sm:$0xff] }
 0x123   : > { %2401 = vrot.lane.b32.xlu0 %v4462_v17, %s3586_s21  ;;  %v1234_v6 = vrot.slane %v4593_v57, 1  ;;  %v1410_v2 = vrot.slane %v4593_v57, 2 }
 0x124   : > { %v1272_v61 = vpop.permute.xlu1 %1271 }
 0x125   : > { %v2374_v17 = vpop.permute.xlu0 %2373  ;;  %v1537_v19 = vsel %vm647_vm4, %v4618_v0, %v1272_v61  ;;  %v4630_v35 = vsel %vm293_vm0, %v1234_v6, %v4609_v39  ;;  %v4656_v26 = vsel %vm470_vm1, %v1410_v2, %v4640_v45  ;;  %v2166_v61 = vsel %vm293_vm0, %v4543_v44, %v2165_v52  ;;  %v4750_v52 = vld [vmem:[%s3631_s19 + $0x90] sm:$0xff] }
 0x126   : > { %v2501_v53 = vsel %vm680_vm3, %v2469_v42, %v2374_v17  ;;  %1301 = vrot.lane.b32.xlu1 %v1233_v41, %s3585_s20  ;;  %v3127_v17 = vld [vmem:[%s3631_s19 + $0x148] sm:$0x3] }
 0x127   : > { %2403 = vrot.lane.b32.xlu0 %v2332_v62, %s3586_s21  ;;  %3468 = vmatprep.mubr.msk.f32.mxu0 %vm722_vm5, %v2501_v53  ;;  %v4684_v53 = vld [vmem:[%s3631_s19 + $0x78] sm:$0xff] }
 0x128   : > { %v1274_v51 = vpop.permute.xlu1 %1273 }
 0x129   : > { %v2376_v8 = vpop.permute.xlu0 %2375  ;;  %v1538_v28 = vsel %vm647_vm4, %v4612_v47, %v1274_v51 }
 0x12a   : > { %v2502_v55 = vsel %vm680_vm3, %v2470_v38, %v2376_v8  ;;  %1477 = vrot.lane.b32.xlu1 %v1409_v30, %s3586_s21  ;;  %v1242_v8 = vrot.slane %v3127_v17, 1 }
 0x12b   : > { %1475 = vrot.lane.b32.xlu0 %v4590_v24, %s3586_s21  ;;  %3469 = vmatmul.mubr.msk.f32.vlgmr.msra.gmra.mxu0 %vm722_vm5, %v2502_v55 }
 0x12c   : > { %v1450_v43 = vpop.permute.xlu1 %1449 }
 0x12d   : > { %v1570_v31 = vsel %vm680_vm3, %v1538_v28, %v1450_v43  ;;  %v1448_v63 = vpop.permute.xlu0 %1447  ;;  %v4706_v28 = vrot.slane %v4662_v54, 2  ;;  %v1418_v43 = vrot.slane %v3127_v17, 2 }
 0x12e   : > { %v1569_v13 = vsel %vm680_vm3, %v1537_v19, %v1448_v63  ;;  %2231 = vrot.lane.b32.xlu1 %v2161_v4, %s3585_s20  ;;  %v2341_v4 = vrot.slane %v3201_v56, 2  ;;  %v3204_v63 = vld [vmem:[%s3631_s19 + $0x130] sm:$0x3] }
 0x12f   : > { %2229 = vrot.lane.b32.xlu0 %v4492_v7, %s3585_s20  ;;  %3425 = vmatprep.mubr.msk.f32.mxu1 %vm722_vm5, %v1569_v13  ;;  %v1238_v7 = vsel %vm293_vm0, %v4609_v39, %v1237_v46 }
 0x130   : > { %3426 = vmatmul.mubr.msk.f32.gmra.mxu1 %vm722_vm5, %v1570_v31  ;;  %v2204_v1 = vpop.permute.xlu1 %2203  ;;  %v2342_v19 = vsel %vm470_vm1, %v4574_v5, %v2341_v4  ;;  %v2170_v5 = vrot.slane %v3204_v63, 1 }
 0x131   : > { %v2202_v50 = vpop.permute.xlu0 %2201  ;;  %v2472_v9 = vsel %vm647_vm4, %v4546_v33, %v2204_v1  ;;  %v1419_v1 = vsel %vm470_vm1, %v4706_v28, %v1418_v43 }
 0x132   : > { %1303 = vrot.lane.b32.xlu1 %v4630_v35, %s3585_s20  ;;  %v2471_v10 = vsel %vm647_vm4, %v4552_v15, %v2202_v50  ;;  %v4659_v15 = vld [vmem:[%s3631_s19 + $0x138] sm:$0xff]  ;;  %v2171_v2 = vsel %vm293_vm0, %v4609_v39, %v2170_v5 }
 0x133   : > { %2405 = vrot.lane.b32.xlu0 %v4528_v25, %s3586_s21  ;;  %v1239_v62 = vrot.slane %v4659_v15, 1  ;;  %v1415_v31 = vrot.slane %v4659_v15, 2 }
 0x134   : > { %v1276_v18 = vpop.permute.xlu1 %1275 }
 0x135   : > { %v2378_v25 = vpop.permute.xlu0 %2377  ;;  %v1539_v30 = vsel %vm647_vm4, %v4684_v53, %v1276_v18  ;;  %v4696_v38 = vsel %vm293_vm0, %v1239_v62, %v4675_v48  ;;  %v4722_v50 = vsel %vm470_vm1, %v1415_v31, %v4706_v28 }
 0x136   : > { %v2503_v49 = vsel %vm680_vm3, %v2471_v10, %v2378_v25  ;;  %1305 = vrot.lane.b32.xlu1 %v1238_v7, %s3585_s20  ;;  %v4728_v7 = vld [vmem:[%s3631_s19 + $0x158] sm:$0xff] }
 0x137   : > { %2407 = vrot.lane.b32.xlu0 %v2337_v12, %s3586_s21  ;;  %3471 = vmatprep.mubr.msk.f32.mxu0 %vm722_vm5, %v2503_v49  ;;  %v4741_v10 = vrot.slane %v4728_v7, 1  ;;  %v4744_v25 = vld [vmem:[%s3631_s19 + $0x98] sm:$0xff]  ;;  %v4772_v17 = vrot.slane %v4728_v7, 2 }
 0x138   : > { %v1278_v40 = vpop.permute.xlu1 %1277 }
 0x139   : > { %v2380_v41 = vpop.permute.xlu0 %2379  ;;  %v1540_v33 = vsel %vm647_vm4, %v4678_v36, %v1278_v40 }
 0x13a   : > { %v2504_v3 = vsel %vm680_vm3, %v2472_v9, %v2380_v41  ;;  %1481 = vrot.lane.b32.xlu1 %v1414_v59, %s3586_s21  ;;  %v3130_v59 = vld [vmem:[%s3631_s19 + $0x160] sm:$0x3] }
 0x13b   : > { %1479 = vrot.lane.b32.xlu0 %v4656_v26, %s3586_s21  ;;  %3472 = vmatmul.mubr.msk.f32.gmra.mxu0 %vm722_vm5, %v2504_v3 }
 0x13c   : > { %v1454_v42 = vpop.permute.xlu1 %1453 }
 0x13d   : > { %v1572_v27 = vsel %vm680_vm3, %v1540_v33, %v1454_v42  ;;  %v1452_v44 = vpop.permute.xlu0 %1451  ;;  %v2346_v33 = vrot.slane %v3204_v63, 2 }
 0x13e   : > { %v1571_v51 = vsel %vm680_vm3, %v1539_v30, %v1452_v44  ;;  %2235 = vrot.lane.b32.xlu1 %v2166_v61, %s3585_s20  ;;  %v1247_v61 = vrot.slane %v3130_v59, 1  ;;  %v1423_v30 = vrot.slane %v3130_v59, 2 }
 0x13f   : > { %2233 = vrot.lane.b32.xlu0 %v4564_v60, %s3585_s20  ;;  %3428 = vmatprep.mubr.msk.f32.mxu1 %vm722_vm5, %v1571_v51  ;;  %v1243_v60 = vsel %vm293_vm0, %v4675_v48, %v1242_v8  ;;  %v2347_v44 = vsel %vm470_vm1, %v4640_v45, %v2346_v33  ;;  %v3207_v8 = vld [vmem:[%s3631_s19 + $0x148] sm:$0x3]  ;;  %v3210_v33 = vld [vmem:[%s3631_s19 + $0x160] sm:$0x3] }
 0x140   : > { %3429 = vmatmul.mubr.msk.f32.gmra.mxu1 %vm722_vm5, %v1572_v27  ;;  %v2208_v55 = vpop.permute.xlu1 %2207  ;;  %v2175_v45 = vrot.slane %v3207_v8, 1  ;;  %v2351_v59 = vrot.slane %v3207_v8, 2 }
 0x141   : > { %v2206_v6 = vpop.permute.xlu0 %2205  ;;  %v2474_v37 = vsel %vm647_vm4, %v4612_v47, %v2208_v55 }
 0x142   : > { %1307 = vrot.lane.b32.xlu1 %v4696_v38, %s3585_s20  ;;  %v2473_v13 = vsel %vm647_vm4, %v4618_v0, %v2206_v6  ;;  %v4725_v0 = vld [vmem:[%s3631_s19 + $0x150] sm:$0xff]  ;;  %v1424_v6 = vsel %vm470_vm1, %v4772_v17, %v1423_v30 }
 0x143   : > { %2409 = vrot.lane.b32.xlu0 %v4590_v24, %s3586_s21  ;;  %v1244_v56 = vrot.slane %v4725_v0, 1  ;;  %v1420_v51 = vrot.slane %v4725_v0, 2 }
 0x144   : > { %v1280_v58 = vpop.permute.xlu1 %1279 }
 0x145   : > { %v2382_v24 = vpop.permute.xlu0 %2381  ;;  %v1541_v40 = vsel %vm647_vm4, %v4750_v52, %v1280_v58  ;;  %v4762_v3 = vsel %vm293_vm0, %v1244_v56, %v4741_v10  ;;  %v4788_v43 = vsel %vm470_vm1, %v1420_v51, %v4772_v17  ;;  %v4794_v58 = vld [vmem:[%s3631_s19 + $0x170] sm:$0xff]  ;;  %v4860_v51 = vld [vmem:[%s3631_s19 + $0x188] sm:$0xff] }
 0x146   : > { %v2505_v46 = vsel %vm680_vm3, %v2473_v13, %v2382_v24  ;;  %1309 = vrot.lane.b32.xlu1 %v1243_v60, %s3585_s20  ;;  %v2176_v13 = vsel %vm293_vm0, %v4675_v48, %v2175_v45  ;;  %v1255_v45 = vrot.slane %v4860_v51, 1 }
 0x147   : > { %2411 = vrot.lane.b32.xlu0 %v2342_v19, %s3586_s21  ;;  %3474 = vmatprep.mubr.msk.f32.mxu0 %vm722_vm5, %v2505_v46  ;;  %v4807_v46 = vrot.slane %v4794_v58, 1 }
 0x148   : > { %v1282_v14 = vpop.permute.xlu1 %1281 }
 0x149   : > { %v2384_v18 = vpop.permute.xlu0 %2383  ;;  %v1542_v47 = vsel %vm647_vm4, %v4744_v25, %v1282_v14  ;;  %v3133_v14 = vld [vmem:[%s3631_s19 + $0x178] sm:$0x3] }
 0x14a   : > { %v2506_v12 = vsel %vm680_vm3, %v2474_v37, %v2384_v18  ;;  %1485 = vrot.lane.b32.xlu1 %v1419_v1, %s3586_s21  ;;  %v4810_v1 = vld [vmem:[%s3631_s19 + $0xb0] sm:$0xff]  ;;  %v4816_v37 = vld [vmem:[%s3631_s19 + $0xa8] sm:$0xff] }
 0x14b   : > { %1483 = vrot.lane.b32.xlu0 %v4722_v50, %s3586_s21  ;;  %3475 = vmatmul.mubr.msk.f32.gmra.mxu0 %vm722_vm5, %v2506_v12 }
 0x14c   : > { %v1458_v49 = vpop.permute.xlu1 %1457 }
 0x14d   : > { %v1574_v9 = vsel %vm680_vm3, %v1542_v47, %v1458_v49  ;;  %v1456_v39 = vpop.permute.xlu0 %1455  ;;  %v1252_v47 = vrot.slane %v3133_v14, 1 }
 0x14e   : > { %v1573_v41 = vsel %vm680_vm3, %v1541_v40, %v1456_v39  ;;  %2239 = vrot.lane.b32.xlu1 %v2171_v2, %s3585_s20  ;;  %v1428_v39 = vrot.slane %v3133_v14, 2  ;;  %v2356_v14 = vrot.slane %v3210_v33, 2 }
 0x14f   : > { %2237 = vrot.lane.b32.xlu0 %v4630_v35, %s3585_s20  ;;  %3431 = vmatprep.mubr.msk.f32.mxu1 %vm722_vm5, %v1573_v41  ;;  %v1248_v35 = vsel %vm293_vm0, %v4741_v10, %v1247_v61  ;;  %v2352_v61 = vsel %vm470_vm1, %v4706_v28, %v2351_v59  ;;  %v3213_v59 = vld [vmem:[%s3631_s19 + $0x178] sm:$0x3] }
 0x150   : > { %3432 = vmatmul.mubr.msk.f32.gmra.mxu1 %vm722_vm5, %v1574_v9  ;;  %v2212_v62 = vpop.permute.xlu1 %2211  ;;  %v4838_v9 = vrot.slane %v4794_v58, 2 }
 0x151   : > { %v2210_v42 = vpop.permute.xlu0 %2209  ;;  %v2476_v19 = vsel %vm647_vm4, %v4678_v36, %v2212_v62 }
 0x152   : > { %1311 = vrot.lane.b32.xlu1 %v4762_v3, %s3585_s20  ;;  %v2475_v55 = vsel %vm647_vm4, %v4684_v53, %v2210_v42  ;;  %v4791_v53 = vld [vmem:[%s3631_s19 + $0x168] sm:$0xff]  ;;  %v1429_v30 = vsel %vm470_vm1, %v4838_v9, %v1428_v39 }
 0x153   : > { %2413 = vrot.lane.b32.xlu0 %v4656_v26, %s3586_s21  ;;  %v1249_v24 = vrot.slane %v4791_v53, 1  ;;  %v1425_v62 = vrot.slane %v4791_v53, 2 }
 0x154   : > { %v1284_v27 = vpop.permute.xlu1 %1283 }
 0x155   : > { %v2386_v26 = vpop.permute.xlu0 %2385  ;;  %v1543_v18 = vsel %vm647_vm4, %v4816_v37, %v1284_v27  ;;  %v4828_v56 = vsel %vm293_vm0, %v1249_v24, %v4807_v46  ;;  %v2180_v27 = vrot.slane %v3210_v33, 1 }
 0x156   : > { %v2507_v4 = vsel %vm680_vm3, %v2475_v55, %v2386_v26  ;;  %1313 = vrot.lane.b32.xlu1 %v1248_v35, %s3585_s20 }
 0x157   : > { %2415 = vrot.lane.b32.xlu0 %v2347_v44, %s3586_s21  ;;  %3477 = vmatprep.mubr.msk.f32.mxu0 %vm722_vm5, %v2507_v4  ;;  %v4854_v44 = vsel %vm470_vm1, %v1425_v62, %v4838_v9  ;;  %v2181_v4 = vsel %vm293_vm0, %v4741_v10, %v2180_v27  ;;  %v3216_v27 = vld [vmem:[%s3631_s19 + $0x190] sm:$0x3] }
 0x158   : > { %v1286_v60 = vpop.permute.xlu1 %1285 }
 0x159   : > { %v2388_v31 = vpop.permute.xlu0 %2387  ;;  %v1544_v36 = vsel %vm647_vm4, %v4810_v1, %v1286_v60 }
 0x15a   : > { %v2508_v63 = vsel %vm680_vm3, %v2476_v19, %v2388_v31  ;;  %1489 = vrot.lane.b32.xlu1 %v1424_v6, %s3586_s21  ;;  %v3136_v19 = vld [vmem:[%s3631_s19 + $0x190] sm:$0x3] }
 0x15b   : > { %1487 = vrot.lane.b32.xlu0 %v4788_v43, %s3586_s21  ;;  %3478 = vmatmul.mubr.msk.f32.gmra.mxu0 %vm722_vm5, %v2508_v63 }
 0x15c   : > { %v1462_v5 = vpop.permute.xlu1 %1461 }
 0x15d   : > { %v1576_v12 = vsel %vm680_vm3, %v1544_v36, %v1462_v5  ;;  %v1460_v48 = vpop.permute.xlu0 %1459  ;;  %v1257_v36 = vrot.slane %v3136_v19, 1 }
 0x15e   : > { %v1575_v2 = vsel %vm680_vm3, %v1543_v18, %v1460_v48  ;;  %2243 = vrot.lane.b32.xlu1 %v2176_v13, %s3585_s20  ;;  %v1433_v48 = vrot.slane %v3136_v19, 2  ;;  %v4930_v19 = vld [vmem:[%s3631_s19 + $0x1a0] sm:$0xff] }
 0x15f   : > { %2241 = vrot.lane.b32.xlu0 %v4696_v38, %s3585_s20  ;;  %3434 = vmatprep.mubr.msk.f32.mxu1 %vm722_vm5, %v1575_v2  ;;  %v1253_v38 = vsel %vm293_vm0, %v4807_v46, %v1252_v47  ;;  %v2357_v47 = vsel %vm470_vm1, %v4772_v17, %v2356_v14 }
 0x160   : > { %3435 = vmatmul.mubr.msk.f32.gmra.mxu1 %vm722_vm5, %v1576_v12  ;;  %v2216_v49 = vpop.permute.xlu1 %2215  ;;  %v1258_v12 = vsel %vm293_vm0, %v1255_v45, %v1257_v36 }
 0x161   : > { %v2214_v40 = vpop.permute.xlu0 %2213  ;;  %v2478_v8 = vsel %vm647_vm4, %v4744_v25, %v2216_v49 }
 0x162   : > { %1315 = vrot.lane.b32.xlu1 %v4828_v56, %s3585_s20  ;;  %v2477_v42 = vsel %vm647_vm4, %v4750_v52, %v2214_v40  ;;  %v4857_v52 = vld [vmem:[%s3631_s19 + $0x180] sm:$0xff] }
 0x163   : > { %2417 = vrot.lane.b32.xlu0 %v4722_v50, %s3586_s21  ;;  %v1254_v6 = vrot.slane %v4857_v52, 1  ;;  %v1430_v49 = vrot.slane %v4857_v52, 2 }
 0x164   : > { %v1288_v41 = vpop.permute.xlu1 %1287 }
 0x165   : > { %v2390_v50 = vpop.permute.xlu0 %2389  ;;  %v1545_v31 = vsel %vm647_vm4, %v4333_v21, %v1288_v41  ;;  %v1256_v10 = vsel %vm293_vm0, %v1254_v6, %v1255_v45  ;;  %v2185_v41 = vrot.slane %v3213_v59, 1 }
 0x166   : > { %v2509_v35 = vsel %vm680_vm3, %v2477_v42, %v2390_v50  ;;  %1317 = vrot.lane.b32.xlu1 %v1253_v38, %s3585_s20  ;;  %v2361_v50 = vrot.slane %v3213_v59, 2 }
 0x167   : > { %2419 = vrot.lane.b32.xlu0 %v2352_v61, %s3586_s21  ;;  %3480 = vmatprep.mubr.msk.f32.mxu0 %vm722_vm5, %v2509_v35  ;;  %v2186_v42 = vsel %vm293_vm0, %v4807_v46, %v2185_v41 }
 0x168   : > { %v1290_v28 = vpop.permute.xlu1 %1289  ;;  %v2362_v46 = vsel %vm470_vm1, %v4838_v9, %v2361_v50 }
 0x169   : > { %v2392_v55 = vpop.permute.xlu0 %2391  ;;  %v1546_v25 = vsel %vm647_vm4, %v4336_v20, %v1290_v28 }
 0x16a   : > { %v2510_v26 = vsel %vm680_vm3, %v2478_v8, %v2392_v55  ;;  %1493 = vrot.lane.b32.xlu1 %v1429_v30, %s3586_s21 }
 0x16b   : > { %1491 = vrot.lane.b32.xlu0 %v4854_v44, %s3586_s21  ;;  %3481 = vmatmul.mubr.msk.f32.gmra.mxu0 %vm722_vm5, %v2510_v26  ;;  %v2190_v26 = vrot.slane %v3216_v27, 1 }
 0x16c   : > { %v1466_v60 = vpop.permute.xlu1 %1465 }
 0x16d   : > { %v1578_v63 = vsel %vm680_vm3, %v1546_v25, %v1466_v60  ;;  %v1464_v13 = vpop.permute.xlu0 %1463  ;;  %v2191_v25 = vsel %vm293_vm0, %v1255_v45, %v2190_v26  ;;  %v2366_v60 = vrot.slane %v3216_v27, 2  ;;  %v2193_v45 = vrot.slane %v4930_v19, 1 }
 0x16e   : > { %v1577_v24 = vsel %vm680_vm3, %v1545_v31, %v1464_v13  ;;  %2247 = vrot.lane.b32.xlu1 %v2181_v4, %s3585_s20  ;;  %v3219_v31 = vld [vmem:[%s3631_s19 + $0x1a8] sm:$0x3]  ;;  %v4936_v13 = vld [vmem:[%s3631_s19 + $0x198] sm:$0xff] }
 0x16f   : > { %2245 = vrot.lane.b32.xlu0 %v4762_v3, %s3585_s20  ;;  %3437 = vmatprep.mubr.msk.f32.mxu1 %vm722_vm5, %v1577_v24  ;;  %v1431_v3 = vrot.slane %v4860_v51, 2  ;;  %v2195_v36 = vrot.slane %v3219_v31, 1  ;;  %v2192_v14 = vrot.slane %v4936_v13, 1 }
 0x170   : > { %3438 = vmatmul.mubr.msk.f32.gmra.mxu1 %vm722_vm5, %v1578_v63  ;;  %v2220_v5 = vpop.permute.xlu1 %2219 }
 0x171   : > { %v2218_v18 = vpop.permute.xlu0 %2217  ;;  %v1432_v61 = vsel %vm470_vm1, %v1430_v49, %v1431_v3  ;;  %v2480_v62 = vsel %vm647_vm4, %v4810_v1, %v2220_v5  ;;  %v2368_v49 = vrot.slane %v4936_v13, 2 }
 0x172   : > { %1319 = vrot.lane.b32.xlu1 %v1256_v10, %s3585_s20  ;;  %v2479_v40 = vsel %vm647_vm4, %v4816_v37, %v2218_v18 }
 0x173   : > { %2421 = vrot.lane.b32.xlu0 %v4788_v43, %s3586_s21  ;;  %v1434_v43 = vsel %vm470_vm1, %v1431_v3, %v1433_v48  ;;  %v2371_v48 = vrot.slane %v3219_v31, 2 }
 0x174   : > { %v1292_v2 = vpop.permute.xlu1 %1291 }
 0x175   : > { %v2394_v38 = vpop.permute.xlu0 %2393  ;;  %v1547_v1 = vsel %vm647_vm4, %v4405_v32, %v1292_v2 }
 0x176   : > { %v2511_v39 = vsel %vm680_vm3, %v2479_v40, %v2394_v38  ;;  %1321 = vrot.lane.b32.xlu1 %v1258_v12, %s3585_s20 }
 0x177   : > { %2423 = vrot.lane.b32.xlu0 %v2357_v47, %s3586_s21  ;;  %3483 = vmatprep.mubr.msk.f32.mxu0 %vm722_vm5, %v2511_v39 }
 0x178   : > { %v1294_v17 = vpop.permute.xlu1 %1293 }
 0x179   : > { %v2396_v37 = vpop.permute.xlu0 %2395  ;;  %v1548_v35 = vsel %vm647_vm4, %v4408_v22, %v1294_v17 }
 0x17a   : > { %v2512_v33 = vsel %vm680_vm3, %v2480_v62, %v2396_v37  ;;  %1497 = vrot.lane.b32.xlu1 %v1434_v43, %s3586_s21 }
 0x17b   : > { %1495 = vrot.lane.b32.xlu0 %v1432_v61, %s3586_s21  ;;  %3484 = vmatmul.mubr.msk.f32.gmra.mxu0 %vm722_vm5, %v2512_v33 }
 0x17c   : > { %v1470_v30 = vpop.permute.xlu1 %1469 }
 0x17d   : > { %v1580_v28 = vsel %vm680_vm3, %v1548_v35, %v1470_v30  ;;  %v1468_v8 = vpop.permute.xlu0 %1467 }
 0x17e   : > { %v1579_v55 = vsel %vm680_vm3, %v1547_v1, %v1468_v8  ;;  %2251 = vrot.lane.b32.xlu1 %v2186_v42, %s3585_s20 }
 0x17f   : > { %2249 = vrot.lane.b32.xlu0 %v4828_v56, %s3585_s20  ;;  %3440 = vmatprep.mubr.msk.f32.mxu1 %vm722_vm5, %v1579_v55 }
 0x180   : > { %3441 = vmatmul.mubr.msk.f32.gmra.mxu1 %vm722_vm5, %v1580_v28  ;;  %v2224_v4 = vpop.permute.xlu1 %2223 }
 0x181   : > { %v2222_v6 = vpop.permute.xlu0 %2221 }
 0x182   : > { %2427 = vrot.lane.b32.xlu1 %v2362_v46, %s3586_s21  ;;  %v2481_v9 = vsel %vm647_vm4, %v4333_v21, %v2222_v6  ;;  %v2482_v21 = vsel %vm647_vm4, %v4336_v20, %v2224_v4  ;;  %v2194_v20 = vsel %vm293_vm0, %v2192_v14, %v2193_v45 }
 0x183   : > { %2425 = vrot.lane.b32.xlu0 %v4854_v44, %s3586_s21  ;;  %v2367_v44 = vsel %vm470_vm1, %v1431_v3, %v2366_v60  ;;  %v2369_v3 = vrot.slane %v4930_v19, 2 }
 0x184   : > { %v1296_v56 = vpop.permute.xlu1 %1295 }
 0x185   : > { %v2398_v63 = vpop.permute.xlu0 %2397  ;;  %v1549_v59 = vsel %vm647_vm4, %v4465_v11, %v1296_v56  ;;  %v2372_v43 = vsel %vm470_vm1, %v2369_v3, %v2371_v48  ;;  %v2370_v17 = vsel %vm470_vm1, %v2368_v49, %v2369_v3 }
 0x186   : > { %v2513_v24 = vsel %vm680_vm3, %v2481_v9, %v2398_v63  ;;  %2255 = vrot.lane.b32.xlu1 %v2191_v25, %s3585_s20 }
 0x187   : > { %2253 = vrot.lane.b32.xlu0 %v1256_v10, %s3585_s20  ;;  %3486 = vmatprep.mubr.msk.f32.mxu0 %vm722_vm5, %v2513_v24  ;;  %v2196_v10 = vsel %vm293_vm0, %v2193_v45, %v2195_v36 }
 0x188   : > { %v1298_v5 = vpop.permute.xlu1 %1297 }
 0x189   : > { %v2400_v18 = vpop.permute.xlu0 %2399  ;;  %v1550_v2 = vsel %vm647_vm4, %v4468_v16, %v1298_v5 }
 0x18a   : > { %v2514_v12 = vsel %vm680_vm3, %v2482_v21, %v2400_v18  ;;  %2431 = vrot.lane.b32.xlu1 %v2367_v44, %s3586_s21  ;;  %v5001_v21 = vpop.f32.mrf.mxu1 }
 0x18b   : > { %2429 = vrot.lane.b32.xlu0 %v1432_v61, %s3586_s21  ;;  %3487 = vmatmul.mubr.msk.f32.gmra.mxu0 %vm722_vm5, %v2514_v12 }
 0x18c   : > { %v1474_v47 = vpop.permute.xlu1 %1473  ;;  %v5007_v48 = vpop.f32.mrf.mxu1 }
 0x18d   : > { %v1582_v40 = vsel %vm680_vm3, %v1550_v2, %v1474_v47  ;;  %v1472_v38 = vpop.permute.xlu0 %1471 }
 0x18e   : > { %v1581_v39 = vsel %vm680_vm3, %v1549_v59, %v1472_v38  ;;  %2259 = vrot.lane.b32.xlu1 %v2196_v10, %s3585_s20  ;;  %v5011_v49 = vpop.f32.mrf.mxu1 }
 0x18f   : > { %2257 = vrot.lane.b32.xlu0 %v2194_v20, %s3585_s20  ;;  %3443 = vmatprep.mubr.msk.f32.mxu1 %vm722_vm5, %v1581_v39 }
 0x190   : > { %3444 = vmatmul.mubr.msk.f32.gmra.mxu1 %vm722_vm5, %v1582_v40  ;;  %v2228_v41 = vpop.permute.xlu1 %2227  ;;  %v5014_v40 = vpop.f32.mrf.mxu0 }
 0x191   : > { %v2226_v61 = vpop.permute.xlu0 %2225  ;;  %v2484_v35 = vsel %vm647_vm4, %v4408_v22, %v2228_v41 }
 0x192   : > { %2435 = vrot.lane.b32.xlu1 %v2372_v43, %s3586_s21  ;;  %v2483_v37 = vsel %vm647_vm4, %v4405_v32, %v2226_v61  ;;  %v5025_v61 = vpop.f32.mrf.mxu0 }
 0x193   : > { %2433 = vrot.lane.b32.xlu0 %v2370_v17, %s3586_s21 }
 0x194   : > { %v1300_v62 = vpop.permute.xlu1 %1299 }
 0x195   : > { %v2402_v33 = vpop.permute.xlu0 %2401  ;;  %v1551_v32 = vsel %vm647_vm4, %v4531_v34, %v1300_v62 }
 0x196   : > { %v2515_v42 = vsel %vm680_vm3, %v2483_v37, %v2402_v33  ;;  %v5031_v33 = vpop.f32.mrf.mxu0 }
 0x197   : > { %3489 = vmatprep.mubr.msk.f32.mxu0 %vm722_vm5, %v2515_v42 }
 0x198   : > { %v1302_v50 = vpop.permute.xlu1 %1301 }
 0x199   : > { %v2404_v30 = vpop.permute.xlu0 %2403  ;;  %v1552_v1 = vsel %vm647_vm4, %v4534_v29, %v1302_v50 }
 0x19a   : > { %v2516_v27 = vsel %vm680_vm3, %v2484_v35, %v2404_v30  ;;  %v5035_v30 = vpop.f32.mrf.mxu0 }
 0x19b   : > { %3490 = vmatmul.mubr.msk.f32.gmra.mxu0 %vm722_vm5, %v2516_v27 }
 0x19c   : > { %v1478_v28 = vpop.permute.xlu1 %1477 }
 0x19d   : > { %v1584_v8 = vsel %vm680_vm3, %v1552_v1, %v1478_v28  ;;  %v1476_v55 = vpop.permute.xlu0 %1475 }
 0x19e   : > { %v1583_v46 = vsel %vm680_vm3, %v1551_v32, %v1476_v55 }
 0x19f   : > { %3446 = vmatprep.mubr.msk.f32.mxu1 %vm722_vm5, %v1583_v46 }
 0x1a0   : > { %3447 = vmatmul.mubr.msk.f32.gmra.mxu1 %vm722_vm5, %v1584_v8  ;;  %v2232_v22 = vpop.permute.xlu1 %2231  ;;  %v5042_v8 = vpop.f32.mrf.mxu0 }
 0x1a1   : > { %v2230_v26 = vpop.permute.xlu0 %2229  ;;  %v2486_v31 = vsel %vm647_vm4, %v4468_v16, %v2232_v22 }
 0x1a2   : > { %v2485_v6 = vsel %vm647_vm4, %v4465_v11, %v2230_v26 }
 0x1a4   : > { %v1304_v4 = vpop.permute.xlu1 %1303 }
 0x1a5   : > { %v2406_v25 = vpop.permute.xlu0 %2405  ;;  %v1553_v11 = vsel %vm647_vm4, %v4593_v57, %v1304_v4 }
 0x1a6   : > { %v2517_v60 = vsel %vm680_vm3, %v2485_v6, %v2406_v25  ;;  %v5050_v6 = vpop.f32.mrf.mxu0 }
 0x1a7   : > { %3492 = vmatprep.mubr.msk.f32.mxu0 %vm722_vm5, %v2517_v60 }
 0x1a8   : > { %v1306_v56 = vpop.permute.xlu1 %1305 }
 0x1a9   : > { %v2408_v9 = vpop.permute.xlu0 %2407  ;;  %v1554_v24 = vsel %vm647_vm4, %v4596_v23, %v1306_v56  ;;  %v5057_v56 = vpop.f32.mrf.mxu0 }
 0x1aa   : > { %v2518_v63 = vsel %vm680_vm3, %v2486_v31, %v2408_v9 }
 0x1ab   : > { %3493 = vmatmul.mubr.msk.f32.gmra.mxu0 %vm722_vm5, %v2518_v63 }
 0x1ac   : > { %v1482_v44 = vpop.permute.xlu1 %1481 }
 0x1ad   : > { %v1586_v45 = vsel %vm680_vm3, %v1554_v24, %v1482_v44  ;;  %v1480_v36 = vpop.permute.xlu0 %1479 }
 0x1ae   : > { %v1585_v5 = vsel %vm680_vm3, %v1553_v11, %v1480_v36  ;;  %v5067_v11 = vpop.f32.mrf.mxu0 }
 0x1af   : > { %3449 = vmatprep.mubr.msk.f32.mxu1 %vm722_vm5, %v1585_v5 }
 0x1b0   : > { %3450 = vmatmul.mubr.msk.f32.gmra.mxu1 %vm722_vm5, %v1586_v45  ;;  %v2236_v16 = vpop.permute.xlu1 %2235  ;;  %v5071_v5 = vpop.f32.mrf.mxu0 }
 0x1b1   : > { %v2234_v14 = vpop.permute.xlu0 %2233  ;;  %v2488_v47 = vsel %vm647_vm4, %v4534_v29, %v2236_v16  ;;  %v5022_v29 = vpop.f32.mrf.mxu1 }
 0x1b2   : > { %v2487_v12 = vsel %vm647_vm4, %v4531_v34, %v2234_v14 }
 0x1b3   : > { %v5028_v62 = vpop.f32.mrf.mxu1 }
 0x1b4   : > { %v1308_v18 = vpop.permute.xlu1 %1307 }
 0x1b5   : > { %v2410_v10 = vpop.permute.xlu0 %2409  ;;  %v1555_v39 = vsel %vm647_vm4, %v4659_v15, %v1308_v18  ;;  %v5033_v50 = vpop.f32.mrf.mxu1 }
 0x1b6   : > { %v2519_v3 = vsel %vm680_vm3, %v2487_v12, %v2410_v10 }
 0x1b7   : > { %3495 = vmatprep.mubr.msk.f32.mxu0 %vm722_vm5, %v2519_v3  ;;  %v5039_v28 = vpop.f32.mrf.mxu1  ;;  %v5078_v3 = vpop.f32.mrf.mxu0 }
 0x1b8   : > { %v1310_v2 = vpop.permute.xlu1 %1309 }
 0x1b9   : > { %v2412_v20 = vpop.permute.xlu0 %2411  ;;  %v1556_v34 = vsel %vm647_vm4, %v4662_v54, %v1310_v2  ;;  %v5047_v26 = vpop.f32.mrf.mxu1 }
 0x1ba   : > { %v2520_v59 = vsel %vm680_vm3, %v2488_v47, %v2412_v20  ;;  %v5083_v20 = vpop.f32.mrf.mxu0 }
 0x1bb   : > { %3496 = vmatmul.mubr.msk.f32.gmra.mxu0 %vm722_vm5, %v2520_v59 }
 0x1bc   : > { %v1486_v38 = vpop.permute.xlu1 %1485 }
 0x1bd   : > { %v1588_v43 = vsel %vm680_vm3, %v1556_v34, %v1486_v38  ;;  %v1484_v41 = vpop.permute.xlu0 %1483 }
 0x1be   : > { %v1587_v17 = vsel %vm680_vm3, %v1555_v39, %v1484_v41  ;;  %v5093_v41 = vpop.f32.mrf.mxu0 }
 0x1bf   : > { %3452 = vmatprep.mubr.msk.f32.mxu1 %vm722_vm5, %v1587_v17 }
 0x1c0   : > { %3453 = vmatmul.mubr.msk.f32.gmra.mxu1 %vm722_vm5, %v1588_v43  ;;  %v2240_v37 = vpop.permute.xlu1 %2239 }
 0x1c1   : > { %v2238_v42 = vpop.permute.xlu0 %2237  ;;  %v2490_v46 = vsel %vm647_vm4, %v4596_v23, %v2240_v37 }
 0x1c2   : > { %v2489_v27 = vsel %vm647_vm4, %v4593_v57, %v2238_v42  ;;  %v5053_v57 = vpop.f32.mrf.mxu1 }
 0x1c4   : > { %v1312_v35 = vpop.permute.xlu1 %1311  ;;  %v5064_v24 = vpop.f32.mrf.mxu1 }
 0x1c5   : > { %v2414_v1 = vpop.permute.xlu0 %2413  ;;  %v1557_v23 = vsel %vm647_vm4, %v4725_v0, %v1312_v35 }
 0x1c6   : > { %v2521_v32 = vsel %vm680_vm3, %v2489_v27, %v2414_v1  ;;  %v5069_v36 = vpop.f32.mrf.mxu1 }
 0x1c7   : > { %3498 = vmatprep.mubr.msk.f32.mxu0 %vm722_vm5, %v2521_v32 }
 0x1c8   : > { %v1314_v55 = vpop.permute.xlu1 %1313  ;;  %v5075_v12 = vpop.f32.mrf.mxu1 }
 0x1c9   : > { %v2416_v22 = vpop.permute.xlu0 %2415  ;;  %v1558_v25 = vsel %vm647_vm4, %v4728_v7, %v1314_v55  ;;  %v5101_v27 = vpop.f32.mrf.mxu0 }
 0x1ca   : > { %v2522_v4 = vsel %vm680_vm3, %v2490_v46, %v2416_v22  ;;  %v5081_v2 = vpop.f32.mrf.mxu1 }
 0x1cb   : > { %3499 = vmatmul.mubr.msk.f32.gmra.mxu0 %vm722_vm5, %v2522_v4  ;;  %v5107_v46 = vpop.f32.mrf.mxu0 }
 0x1cc   : > { %v1490_v60 = vpop.permute.xlu1 %1489  ;;  %v5089_v38 = vpop.f32.mrf.mxu1 }
 0x1cd   : > { %v1590_v31 = vsel %vm680_vm3, %v1558_v25, %v1490_v60  ;;  %v1488_v9 = vpop.permute.xlu0 %1487 }
 0x1ce   : > { %v1589_v63 = vsel %vm680_vm3, %v1557_v23, %v1488_v9  ;;  %v5117_v9 = vld [vmem:[%s5271_s2] ss:$0 sm:$0xff] }
 0x1cf   : > { %3455 = vmatprep.mubr.msk.f32.mxu1 %vm722_vm5, %v1589_v63  ;;  %v895_v63 = vadd.f32 %v5014_v40, %v5117_v9 }
 0x1d0   : > { %3456 = vmatmul.mubr.msk.f32.gmra.mxu1 %vm722_vm5, %v1590_v31  ;;  %v2244_v44 = vpop.permute.xlu1 %2243 }
 0x1d1   : > { %v2242_v45 = vpop.permute.xlu0 %2241  ;;  %v2492_v59 = vsel %vm647_vm4, %v4662_v54, %v2244_v44  ;;  %v5098_v54 = vpop.f32.mrf.mxu1 }
 0x1d2   : > { %v2491_v14 = vsel %vm647_vm4, %v4659_v15, %v2242_v45 }
 0x1d3   : > { %v5105_v55 = vpop.f32.mrf.mxu1 }
 0x1d4   : > { %v1316_v16 = vpop.permute.xlu1 %1315 }
 0x1d5   : > { %v2418_v18 = vpop.permute.xlu0 %2417  ;;  %v1559_v17 = vsel %vm647_vm4, %v4791_v53, %v1316_v16  ;;  %v3418_v22 = vpop.f32.mrf.mxu1 }
 0x1d6   : > { %v2523_v10 = vsel %vm680_vm3, %v2491_v14, %v2418_v18  ;;  %v890_v18 = vadd.f32 %v5117_v9, %v5025_v61 }
 0x1d7   : > { %3501 = vmatprep.mubr.msk.f32.mxu0 %vm722_vm5, %v2523_v10  ;;  %v1763_v44 = vpop.f32.mrf.mxu1  ;;  %v1955_v10 = vadd.f32 %v3418_v22, %v895_v63 }
 0x1d8   : > { %v1318_v47 = vpop.permute.xlu1 %1317  ;;  %v5109_v25 = vpop.f32.mrf.mxu0 }
 0x1d9   : > { %v2420_v34 = vpop.permute.xlu0 %2419  ;;  %v1560_v39 = vsel %vm647_vm4, %v4794_v58, %v1318_v47 }
 0x1da   : > { %v2524_v15 = vsel %vm680_vm3, %v2492_v59, %v2420_v34  ;;  %v5123_v16 = vpop.f32.mrf.mxu0  ;;  %v1954_v59 = vadd.f32 %v1763_v44, %v890_v18  ;;  %v905_v44 = vadd.f32 %v5031_v33, %v5117_v9 }
 0x1db   : > { %3502 = vmatmul.mubr.msk.f32.gmra.mxu0 %vm722_vm5, %v2524_v15 }
 0x1dc   : > { %v1494_v43 = vpop.permute.xlu1 %1493 }
 0x1dd   : > { %v1592_v37 = vsel %vm680_vm3, %v1560_v39, %v1494_v43  ;;  %v1492_v42 = vpop.permute.xlu0 %1491 }
 0x1de   : > { %v1591_v35 = vsel %vm680_vm3, %v1559_v17, %v1492_v42 }
 0x1df   : > { %3458 = vmatprep.mubr.msk.f32.mxu1 %vm722_vm5, %v1591_v35 }
 0x1e0   : > { %3459 = vmatmul.mubr.msk.f32.gmra.mxu1 %vm722_vm5, %v1592_v37  ;;  %v2248_v1 = vpop.permute.xlu1 %2247 }
 0x1e1   : > { %v2246_v32 = vpop.permute.xlu0 %2245 }
 0x1e2   : > { %v2493_v60 = vsel %vm647_vm4, %v4725_v0, %v2246_v32  ;;  %v2494_v0 = vsel %vm647_vm4, %v4728_v7, %v2248_v1 }
 0x1e4   : > { %v1320_v4 = vpop.permute.xlu1 %1319 }
 0x1e5   : > { %v2422_v23 = vpop.permute.xlu0 %2421  ;;  %v1561_v61 = vsel %vm647_vm4, %v4857_v52, %v1320_v4  ;;  %v3421_v4 = vpop.f32.mrf.mxu1 }
 0x1e6   : > { %v2525_v31 = vsel %vm680_vm3, %v2493_v60, %v2422_v23 }
 0x1e7   : > { %3504 = vmatprep.mubr.msk.f32.mxu0 %vm722_vm5, %v2525_v31 }
 0x1e8   : > { %v1322_v45 = vpop.permute.xlu1 %1321 }
 0x1e9   : > { %v2424_v14 = vpop.permute.xlu0 %2423  ;;  %v1562_v7 = vsel %vm647_vm4, %v4860_v51, %v1322_v45 }
 0x1ea   : > { %v2526_v47 = vsel %vm680_vm3, %v2494_v0, %v2424_v14  ;;  %v1957_v14 = vadd.f32 %v3421_v4, %v905_v44 }
 0x1eb   : > { %v3470_v40 = vpop.f32.mrf.mxu0  ;;  %3505 = vmatmul.mubr.msk.f32.gmra.mxu0 %vm722_vm5, %v2526_v47 }
 0x1ec   : > { %v2893_v34 = vadd.f32 %v3470_v40, %v1955_v10  ;;  %v1498_v15 = vpop.permute.xlu1 %1497 }
 0x1ed   : > { %v1594_v39 = vsel %vm680_vm3, %v1562_v7, %v1498_v15  ;;  %v2701_v43 = vpop.f32.mrf.mxu0  ;;  %v1496_v17 = vpop.permute.xlu0 %1495 }
 0x1ee   : > { %2925 = vst [vmem:[%s5133_s12 + $0x8] sm:$0xff] %v2893_v34  ;;  %v2892_v37 = vadd.f32 %v2701_v43, %v1954_v59  ;;  %v1593_v42 = vsel %vm680_vm3, %v1561_v61, %v1496_v17 }
 0x1ef   : > { %3461 = vmatprep.mubr.msk.f32.mxu1 %vm722_vm5, %v1593_v42 }
 0x1f0   : > { %2924 = vst [vmem:[%s5133_s12] sm:$0xff] %v2892_v37  ;;  %3462 = vmatmul.mubr.msk.f32.gmra.mxu1 %vm722_vm5, %v1594_v39  ;;  %v2252_v35 = vpop.permute.xlu1 %2251 }
 0x1f1   : > { %v2250_v1 = vpop.permute.xlu0 %2249  ;;  %v2496_v32 = vsel %vm647_vm4, %v4794_v58, %v2252_v35  ;;  %v1773_v58 = vpop.f32.mrf.mxu1 }
 0x1f2   : > { %v2495_v60 = vsel %vm647_vm4, %v4791_v53, %v2250_v1  ;;  %v900_v53 = vadd.f32 %v5117_v9, %v5035_v30 }
 0x1f4   : > { %v2428_v22 = vpop.permute.xlu1 %2427  ;;  %v1956_v10 = vadd.f32 %v1773_v58, %v900_v53  ;;  %v920_v58 = vadd.f32 %v5117_v9, %v5067_v11 }
 0x1f5   : > { %v2528_v23 = vsel %vm680_vm3, %v2496_v32, %v2428_v22  ;;  %v2426_v31 = vpop.permute.xlu0 %2425  ;;  %v915_v32 = vadd.f32 %v5042_v8, %v5117_v9  ;;  %v910_v22 = vadd.f32 %v5117_v9, %v5050_v6  ;;  %v925_v8 = vadd.f32 %v5057_v56, %v5117_v9 }
 0x1f6   : > { %v2527_v63 = vsel %vm680_vm3, %v2495_v60, %v2426_v31  ;;  %v930_v56 = vadd.f32 %v5117_v9, %v5078_v3 }
 0x1f7   : > { %3507 = vmatprep.mubr.msk.f32.mxu0 %vm722_vm5, %v2527_v63 }
 0x1f8   : > { %3508 = vmatmul.mubr.msk.f32.gmra.mxu0 %vm722_vm5, %v2528_v23  ;;  %v2256_v45 = vpop.permute.xlu1 %2255 }
 0x1f9   : > { %v2254_v0 = vpop.permute.xlu0 %2253  ;;  %v2498_v47 = vsel %vm647_vm4, %v4860_v51, %v2256_v45 }
 0x1fa   : > { %v2497_v33 = vsel %vm647_vm4, %v4857_v52, %v2254_v0  ;;  %v3424_v52 = vpop.f32.mrf.mxu1 }
 0x1fb   : > { %v3473_v18 = vpop.f32.mrf.mxu0  ;;  %v1959_v4 = vadd.f32 %v3424_v52, %v915_v32 }
 0x1fc   : > { %v2895_v40 = vadd.f32 %v3473_v18, %v1957_v14  ;;  %v2432_v59 = vpop.permute.xlu1 %2431 }
 0x1fd   : > { %v2530_v7 = vsel %vm680_vm3, %v2498_v47, %v2432_v59  ;;  %v2711_v34 = vpop.f32.mrf.mxu0  ;;  %v2430_v15 = vpop.permute.xlu0 %2429 }
 0x1fe   : > { %2927 = vst [vmem:[%s5133_s12 + $0x18] sm:$0xff] %v2895_v40  ;;  %v2894_v61 = vadd.f32 %v2711_v34, %v1956_v10  ;;  %v2529_v39 = vsel %vm680_vm3, %v2497_v33, %v2430_v15  ;;  %v935_v40 = vadd.f32 %v5071_v5, %v5117_v9  ;;  %v940_v5 = vadd.f32 %v5117_v9, %v5093_v41 }
 0x1ff   : > { %3510 = vmatprep.mubr.msk.f32.mxu0 %vm722_vm5, %v2529_v39 }
 0x200   : > { %2926 = vst [vmem:[%s5133_s12 + $0x10] sm:$0xff] %v2894_v61  ;;  %3511 = vmatmul.mubr.msk.f32.gmra.mxu0 %vm722_vm5, %v2530_v7  ;;  %v2260_v30 = vpop.permute.xlu1 %2259 }
 0x201   : > { %v2258_v51 = vpop.permute.xlu0 %2257  ;;  %v2500_v43 = vsel %vm647_vm4, %v4930_v19, %v2260_v30  ;;  %v1783_v19 = vpop.f32.mrf.mxu1  ;;  %v945_v30 = vadd.f32 %v5083_v20, %v5117_v9  ;;  %v950_v20 = vadd.f32 %v5117_v9, %v5107_v46 }
 0x202   : > { %v2499_v37 = vsel %vm647_vm4, %v4936_v13, %v2258_v51  ;;  %v1958_v13 = vadd.f32 %v1783_v19, %v910_v22 }
 0x203   : > { %v3427_v44 = vpop.f32.mrf.mxu1 }
 0x204   : > { %v2436_v17 = vpop.permute.xlu1 %2435  ;;  %v1961_v0 = vadd.f32 %v3427_v44, %v925_v8 }
 0x205   : > { %v2532_v42 = vsel %vm680_vm3, %v2500_v43, %v2436_v17  ;;  %v2434_v35 = vpop.permute.xlu0 %2433  ;;  %v1793_v45 = vpop.f32.mrf.mxu1 }
 0x206   : > { %v2531_v1 = vsel %vm680_vm3, %v2499_v37, %v2434_v35  ;;  %v1960_v53 = vadd.f32 %v1793_v45, %v920_v58 }
 0x207   : > { %3513 = vmatprep.mubr.msk.f32.mxu0 %vm722_vm5, %v2531_v1  ;;  %v3430_v47 = vpop.f32.mrf.mxu1  ;;  %v955_v1 = vadd.f32 %v5101_v27, %v5117_v9  ;;  %v960_v27 = vadd.f32 %v5117_v9, %v5123_v16 }
 0x208   : > { %3514 = vmatmul.mubr.msk.f32.gmra.mxu0 %vm722_vm5, %v2532_v42  ;;  %v1963_v33 = vadd.f32 %v3430_v47, %v935_v40 }
 0x209   : > { %v1803_v59 = vpop.f32.mrf.mxu1 }
 0x20a   : > { %v1962_v7 = vadd.f32 %v1803_v59, %v930_v56 }
 0x20b   : > { %v3476_v60 = vpop.f32.mrf.mxu0 }
 0x20c   : > { %v2897_v23 = vadd.f32 %v3476_v60, %v1959_v4 }
 0x20d   : > { %v2721_v31 = vpop.f32.mrf.mxu0 }
 0x20e   : > { %2929 = vst [vmem:[%s5133_s12 + $0x28] sm:$0xff] %v2897_v23  ;;  %v2896_v63 = vadd.f32 %v2721_v31, %v1958_v13  ;;  %v965_v31 = vadd.f32 %v5109_v25, %v5117_v9  ;;  %v970_v25 = vadd.f32 %v5117_v9, %v5007_v48 }
 0x210   : > { %2928 = vst [vmem:[%s5133_s12 + $0x20] sm:$0xff] %v2896_v63  ;;  %v3433_v39 = vpop.f32.mrf.mxu1 }
 0x211   : > { %v1965_v43 = vadd.f32 %v3433_v39, %v945_v30 }
 0x212   : > { %v1813_v51 = vpop.f32.mrf.mxu1 }
 0x213   : > { %v1964_v17 = vadd.f32 %v1813_v51, %v940_v5  ;;  %v995_v51 = vadd.f32 %v5028_v62, %v5117_v9  ;;  %v1000_v62 = vadd.f32 %v5117_v9, %v5047_v26 }
 0x21b   : > { %v3479_v6 = vpop.f32.mrf.mxu0 }
 0x21c   : > { %v2899_v14 = vadd.f32 %v3479_v6, %v1961_v0 }
 0x21d   : > { %v2731_v18 = vpop.f32.mrf.mxu0 }
 0x21e   : > { %2931 = vst [vmem:[%s5133_s12 + $0x38] sm:$0xff] %v2899_v14  ;;  %v2898_v10 = vadd.f32 %v2731_v18, %v1960_v53  ;;  %v975_v53 = vadd.f32 %v5001_v21, %v5117_v9  ;;  %v980_v21 = vadd.f32 %v5117_v9, %v5022_v29 }
 0x220   : > { %2930 = vst [vmem:[%s5133_s12 + $0x30] sm:$0xff] %v2898_v10  ;;  %v3436_v35 = vpop.f32.mrf.mxu1 }
 0x221   : > { %v1967_v19 = vadd.f32 %v3436_v35, %v955_v1  ;;  %v1005_v35 = vadd.f32 %v5039_v28, %v5117_v9  ;;  %v1010_v28 = vadd.f32 %v5117_v9, %v5064_v24 }
 0x222   : > { %v1823_v32 = vpop.f32.mrf.mxu1 }
 0x223   : > { %v1966_v22 = vadd.f32 %v1823_v32, %v950_v20 }
 0x22b   : > { %v3482_v11 = vpop.f32.mrf.mxu0 }
 0x22c   : > { %v2901_v34 = vadd.f32 %v3482_v11, %v1963_v33  ;;  %v985_v33 = vadd.f32 %v5011_v49, %v5117_v9  ;;  %v990_v49 = vadd.f32 %v5117_v9, %v5033_v50 }
 0x22d   : > { %v2741_v15 = vpop.f32.mrf.mxu0 }
 0x22e   : > { %2933 = vst [vmem:[%s5133_s12 + $0x48] sm:$0xff] %v2901_v34  ;;  %v2900_v61 = vadd.f32 %v2741_v15, %v1962_v7 }
 0x230   : > { %2932 = vst [vmem:[%s5133_s12 + $0x40] sm:$0xff] %v2900_v61  ;;  %v3439_v23 = vpop.f32.mrf.mxu1 }
 0x231   : > { %v1969_v44 = vadd.f32 %v3439_v23, %v965_v31 }
 0x232   : > { %v1833_v63 = vpop.f32.mrf.mxu1 }
 0x233   : > { %v1968_v8 = vadd.f32 %v1833_v63, %v960_v27 }
 0x23b   : > { %v3485_v3 = vpop.f32.mrf.mxu0 }
 0x23c   : > { %v2903_v52 = vadd.f32 %v3485_v3, %v1965_v43 }
 0x23d   : > { %v2751_v37 = vpop.f32.mrf.mxu0 }
 0x23e   : > { %2935 = vst [vmem:[%s5133_s12 + $0x58] sm:$0xff] %v2903_v52  ;;  %v2902_v42 = vadd.f32 %v2751_v37, %v1964_v17 }
 0x240   : > { %2934 = vst [vmem:[%s5133_s12 + $0x50] sm:$0xff] %v2902_v42  ;;  %v3442_v6 = vpop.f32.mrf.mxu1 }
 0x241   : > { %v1971_v18 = vadd.f32 %v3442_v6, %v975_v53 }
 0x242   : > { %v1843_v14 = vpop.f32.mrf.mxu1 }
 0x243   : > { %v1970_v10 = vadd.f32 %v1843_v14, %v970_v25 }
 0x24b   : > { %v3488_v41 = vpop.f32.mrf.mxu0 }
 0x24c   : > { %v2905_v4 = vadd.f32 %v3488_v41, %v1967_v19 }
 0x24d   : > { %v2761_v60 = vpop.f32.mrf.mxu0 }
 0x24e   : > { %2937 = vst [vmem:[%s5133_s12 + $0x68] sm:$0xff] %v2905_v4  ;;  %v2904_v13 = vadd.f32 %v2761_v60, %v1966_v22  ;;  %v1015_v60 = vadd.f32 %v5053_v57, %v5117_v9  ;;  %v1020_v57 = vadd.f32 %v5117_v9, %v5075_v12 }
 0x250   : > { %2936 = vst [vmem:[%s5133_s12 + $0x60] sm:$0xff] %v2904_v13  ;;  %v3445_v56 = vpop.f32.mrf.mxu1 }
 0x251   : > { %v1973_v7 = vadd.f32 %v3445_v56, %v985_v33 }
 0x252   : > { %v1853_v11 = vpop.f32.mrf.mxu1 }
 0x253   : > { %v1972_v34 = vadd.f32 %v1853_v11, %v980_v21  ;;  %v1045_v11 = vadd.f32 %v5098_v54, %v5117_v9  ;;  %v1040_v21 = vadd.f32 %v5117_v9, %v5105_v55 }
 0x25b   : > { %v3491_v46 = vpop.f32.mrf.mxu0 }
 0x25c   : > { %v2907_v45 = vadd.f32 %v3491_v46, %v1969_v44 }
 0x25d   : > { %v2771_v58 = vpop.f32.mrf.mxu0 }
 0x25e   : > { %2939 = vst [vmem:[%s5133_s12 + $0x78] sm:$0xff] %v2907_v45  ;;  %v2906_v0 = vadd.f32 %v2771_v58, %v1968_v8  ;;  %v1025_v8 = vadd.f32 %v5069_v36, %v5117_v9  ;;  %v1030_v36 = vadd.f32 %v5117_v9, %v5089_v38 }
 0x260   : > { %2938 = vst [vmem:[%s5133_s12 + $0x70] sm:$0xff] %v2906_v0  ;;  %v3448_v30 = vpop.f32.mrf.mxu1 }
 0x261   : > { %v1975_v43 = vadd.f32 %v3448_v30, %v995_v51 }
 0x262   : > { %v1863_v5 = vpop.f32.mrf.mxu1 }
 0x263   : > { %v1974_v3 = vadd.f32 %v1863_v5, %v990_v49 }
 0x26b   : > { %v3494_v16 = vpop.f32.mrf.mxu0 }
 0x26c   : > { %v2909_v47 = vadd.f32 %v3494_v16, %v1971_v18  ;;  %v1035_v18 = vadd.f32 %v5081_v2, %v5117_v9 }
 0x26d   : > { %v2781_v40 = vpop.f32.mrf.mxu0 }
 0x26e   : > { %2941 = vst [vmem:[%s5133_s12 + $0x88] sm:$0xff] %v2909_v47  ;;  %v2908_v59 = vadd.f32 %v2781_v40, %v1970_v10 }
 0x270   : > { %2940 = vst [vmem:[%s5133_s12 + $0x80] sm:$0xff] %v2908_v59  ;;  %v3451_v42 = vpop.f32.mrf.mxu1 }
 0x271   : > { %v1977_v32 = vadd.f32 %v3451_v42, %v1005_v35 }
 0x272   : > { %v1873_v1 = vpop.f32.mrf.mxu1 }
 0x273   : > { %v1976_v20 = vadd.f32 %v1873_v1, %v1000_v62 }
 0x27b   : > { %v3497_v48 = vpop.f32.mrf.mxu0 }
 0x27c   : > { %v2911_v15 = vadd.f32 %v3497_v48, %v1973_v7 }
 0x27d   : > { %v2791_v61 = vpop.f32.mrf.mxu0 }
 0x27e   : > { %2943 = vst [vmem:[%s5133_s12 + $0x98] sm:$0xff] %v2911_v15  ;;  %v2910_v39 = vadd.f32 %v2791_v61, %v1972_v34 }
 0x280   : > { %2942 = vst [vmem:[%s5133_s12 + $0x90] sm:$0xff] %v2910_v39  ;;  %v3454_v4 = vpop.f32.mrf.mxu1 }
 0x281   : > { %v1979_v23 = vadd.f32 %v3454_v4, %v1015_v60 }
 0x282   : > { %v1883_v13 = vpop.f32.mrf.mxu1 }
 0x283   : > { %v1978_v31 = vadd.f32 %v1883_v13, %v1010_v28 }
 0x28b   : > { %v3500_v29 = vpop.f32.mrf.mxu0 }
 0x28c   : > { %v2913_v17 = vadd.f32 %v3500_v29, %v1975_v43 }
 0x28d   : > { %v2801_v52 = vpop.f32.mrf.mxu0 }
 0x28e   : > { %2945 = vst [vmem:[%s5133_s12 + $0xa8] sm:$0xff] %v2913_v17  ;;  %v2912_v37 = vadd.f32 %v2801_v52, %v1974_v3 }
 0x290   : > { %2944 = vst [vmem:[%s5133_s12 + $0xa0] sm:$0xff] %v2912_v37  ;;  %v3457_v46 = vpop.f32.mrf.mxu1 }
 0x291   : > { %v1981_v58 = vadd.f32 %v3457_v46, %v1025_v8 }
 0x292   : > { %v1893_v45 = vpop.f32.mrf.mxu1 }
 0x293   : > { %v1980_v0 = vadd.f32 %v1893_v45, %v1020_v57 }
 0x29b   : > { %v3503_v50 = vpop.f32.mrf.mxu0 }
 0x29c   : > { %v2915_v19 = vadd.f32 %v3503_v50, %v1977_v32 }
 0x29d   : > { %v2811_v41 = vpop.f32.mrf.mxu0 }
 0x29e   : > { %2947 = vst [vmem:[%s5133_s12 + $0xb8] sm:$0xff] %v2915_v19  ;;  %v2914_v22 = vadd.f32 %v2811_v41, %v1976_v20 }
 0x2a0   : > { %2946 = vst [vmem:[%s5133_s12 + $0xb0] sm:$0xff] %v2914_v22  ;;  %v3460_v53 = vpop.f32.mrf.mxu1 }
 0x2a1   : > { %v1983_v10 = vadd.f32 %v3460_v53, %v1035_v18 }
 0x2a2   : > { %v1903_v16 = vpop.f32.mrf.mxu1 }
 0x2a3   : > { %v1982_v47 = vadd.f32 %v1903_v16, %v1030_v36 }
 0x2ab   : > { %v3506_v26 = vpop.f32.mrf.mxu0 }
 0x2ac   : > { %v2917_v63 = vadd.f32 %v3506_v26, %v1979_v23 }
 0x2ad   : > { %v2821_v27 = vpop.f32.mrf.mxu0 }
 0x2ae   : > { %2949 = vst [vmem:[%s5133_s12 + $0xc8] sm:$0xff] %v2917_v63  ;;  %v2916_v44 = vadd.f32 %v2821_v27, %v1978_v31 }
 0x2b0   : > { %2948 = vst [vmem:[%s5133_s12 + $0xc0] sm:$0xff] %v2916_v44  ;;  %v3463_v59 = vpop.f32.mrf.mxu1 }
 0x2b1   : > { %v1985_v7 = vadd.f32 %v3463_v59, %v1045_v11 }
 0x2b2   : > { %v1913_v2 = vpop.f32.mrf.mxu1 }
 0x2b3   : > { %v1984_v48 = vadd.f32 %v1913_v2, %v1040_v21 }
 0x2b8   : > { %v3509_v24 = vpop.f32.mrf.mxu0 }
 0x2b9   : > { %v2919_v6 = vadd.f32 %v3509_v24, %v1981_v58 }
 0x2ba   : > { %v2831_v14 = vpop.f32.mrf.mxu0 }
 0x2bb   : > { %2951 = vst [vmem:[%s5133_s12 + $0xd8] sm:$0xff] %v2919_v6  ;;  %v2918_v25 = vadd.f32 %v2831_v14, %v1980_v0 }
 0x2bd   : > { %2950 = vst [vmem:[%s5133_s12 + $0xd0] sm:$0xff] %v2918_v25 }
 0x2c0   : > { %v3512_v12 = vpop.f32.mrf.mxu0 }
 0x2c1   : > { %v2921_v40 = vadd.f32 %v3512_v12, %v1983_v10 }
 0x2c2   : > { %v2841_v56 = vpop.f32.mrf.mxu0 }
 0x2c3   : > { %2953 = vst [vmem:[%s5133_s12 + $0xe8] sm:$0xff] %v2921_v40  ;;  %v2920_v33 = vadd.f32 %v2841_v56, %v1982_v47 }
 0x2c5   : > { %2952 = vst [vmem:[%s5133_s12 + $0xe0] sm:$0xff] %v2920_v33 }
 0x2c8   : > { %v3515_v38 = vpop.f32.mrf.mxu0 }
 0x2c9   : > { %v2923_v34 = vadd.f32 %v3515_v38, %v1985_v7 }
 0x2ca   : > { %v2851_v15 = vpop.f32.mrf.mxu0 }
 0x2cb   : > { %2955 = vst [vmem:[%s5133_s12 + $0xf8] sm:$0xff] %v2923_v34  ;;  %v2922_v61 = vadd.f32 %v2851_v15, %v1984_v48 }
 0x2cd   : > { %2954 = vst [vmem:[%s5133_s12 + $0xf0] sm:$0xff] %v2922_v61 }
 0x2ce PF: > { %s13_s14 = sadd.s32 1, %s3583_s14   ;;  %s5325_s12 = smov %s3579_s13 }
 0x2cf   : > { %p10_p5 = scmp.ge.s32.totalorder %s13_s14, 4   ;;  %s5326_s13 = smov %s5328_s15 }
 0x2d1   :  { %12 = sbr.rel (!%p10_p5) target bundleno = 2 (0x2), region = 67 }

</bundles_post_ra>
